<compile_context>
chip_gen: v7x
topology: tpu7x:2x2x1
jax: 0.10.0
libtpu: 0.0.40
codegen_flags: <defaults>
</compile_context>

<pallas_src>
import functools

import jax
import jax.numpy as jnp
from jax import lax
from jax.experimental import pallas as pl
from jax.experimental.pallas import tpu as pltpu

_NEG_BIG = jnp.float32(-1e30)   # padded-tag bias; exp underflows to 0 exactly


# ---------------------------------------------------------------------------
# Kernel
# ---------------------------------------------------------------------------
def _make_kernel(meta):
    """Builds the fused kernel with static slab offsets baked in."""
    H = meta["H"]
    G = meta["G"]                      # 4 * H
    mfcc_dim = meta["mfcc_dim"]
    tag_pad = meta["tag_pad"]
    offs = meta["offsets"]

    def kernel(x_ref, slab_ref, out_ref, xg0_sc, h2_sc):
        T = x_ref.shape[0]

        def band(off, rows, cols):
            # static row band of the packed weight slab (+ static column trim)
            return slab_ref[pl.ds(off, rows), :][:, :cols]

        # Hoist loop-invariant weights (single VMEM read each).
        wih0 = band(offs["wih0"], mfcc_dim, G)
        whh0 = band(offs["whh0"], H, G)
        b0 = band(offs["b0"], 1, G)
        wih1 = band(offs["wih1"], H, G)
        whh1 = band(offs["whh1"], H, G)
        b1 = band(offs["b1"], 1, G)

        # (1) Batched layer-0 input projection for ALL timesteps, off the
        #     serial critical path.  (g-gate columns of wih0/b0 are pre-scaled
        #     by 2 in the packer -> tanh via sigmoid identity below.)
        xg0_sc[...] = (jnp.dot(x_ref[...], wih0,
                               preferred_element_type=jnp.float32) + b0)

        def step(t, carry):
            h1, c1, h2, c2 = carry

            # ---- layer-1 recurrent half, hoisted: overlaps with layer 0 ----
            g1r = jnp.dot(h2, whh1, preferred_element_type=jnp.float32) + b1

            # ---- layer 0: recurrent contribution only ----
            g0 = xg0_sc[pl.ds(t, 1), :] + jnp.dot(
                h1, whh0, preferred_element_type=jnp.float32)       # (1, 4H)
            s0 = jax.nn.sigmoid(g0)          # single EUP pass over all 4H
            t0 = 2.0 * s0[:, 2 * H:3 * H] - 1.0   # == tanh(g); VPU fixup
            c1 = s0[:, 1 * H:2 * H] * c1 + s0[:, 0 * H:1 * H] * t0
            h1 = s0[:, 3 * H:4 * H] * jnp.tanh(c1)

            # ---- layer 1: only the wih1 dot sits on the serial chain ----
            g1 = g1r + jnp.dot(h1, wih1, preferred_element_type=jnp.float32)
            s1 = jax.nn.sigmoid(g1)
            t1 = 2.0 * s1[:, 2 * H:3 * H] - 1.0
            c2 = s1[:, 1 * H:2 * H] * c2 + s1[:, 0 * H:1 * H] * t1
            h2 = s1[:, 3 * H:4 * H] * jnp.tanh(c2)

            # Stage h2 for the batched classifier after the loop.
            h2_sc[pl.ds(t, 1), :] = h2
            return (h1, c1, h2, c2)

        zeros = jnp.zeros((1, H), jnp.float32)
        lax.fori_loop(0, T, step, (zeros, zeros, zeros, zeros), unroll=True)

        # (4) Batched hidden2tag + log_softmax; single lane-dense (T, 128)
        #     store.  Padded tag columns carry a -1e30 bias: they never win
        #     the max and their exp underflows to 0, so real columns are exact.
        wout = band(offs["wout"], H, tag_pad)
        bout = band(offs["bout"], 1, tag_pad)
        tag = jnp.dot(h2_sc[...], wout,
                      preferred_element_type=jnp.float32) + bout    # (T, pad)
        m = jnp.max(tag, axis=-1, keepdims=True)
        lse = m + jnp.log(jnp.sum(jnp.exp(tag - m), axis=-1, keepdims=True))
        out_ref[...] = tag - lse

    return kernel


# ---------------------------------------------------------------------------
# Parameter packing (done ONCE, outside jit): one lane-dense weight slab.
# ---------------------------------------------------------------------------
def pack_params(params, target_dim):
    """Scale g-gate columns by 2 (tanh->sigmoid identity) and pack all
    weights/biases into a single (rows, W) f32 slab with static offsets."""
    H = params["whh0_t"].shape[0]
    mfcc_dim = params["wih0_t"].shape[0]
    G = 4 * H
    tag_pad = max(128, ((target_dim + 127) // 128) * 128)
    W = max(((G + 127) // 128) * 128, tag_pad)

    def scale_g(w):   # g-gate lanes are [2H:3H] in PyTorch's i,f,g,o order
        return w.at[..., 2 * H:3 * H].multiply(2.0)

    bout_row = jnp.full((1, tag_pad), _NEG_BIG, jnp.float32).at[
        :, :target_dim].set(params["bout"])

    pieces = [
        ("wih0", scale_g(params["wih0_t"])),
        ("whh0", scale_g(params["whh0_t"])),
        ("b0", scale_g(params["b0"])),
        ("wih1", scale_g(params["wih1_t"])),
        ("whh1", scale_g(params["whh1_t"])),
        ("b1", scale_g(params["b1"])),
        ("wout", params["wout_t"]),
        ("bout", bout_row),
    ]

    offsets, blocks, off = {}, [], 0
    for name, arr in pieces:
        r, c = arr.shape
        r_pad = ((r + 7) // 8) * 8                 # sublane-multiple rows
        block = jnp.zeros((r_pad, W), jnp.float32).at[:r, :c].set(arr)
        blocks.append(block)
        offsets[name] = off
        off += r_pad
    slab = jnp.concatenate(blocks, axis=0)

    meta = dict(H=H, mfcc_dim=mfcc_dim, G=G, tag_pad=tag_pad,
                target_dim=target_dim, offsets=offsets)
    return slab, meta


# ---------------------------------------------------------------------------
# Forward wrapper
# ---------------------------------------------------------------------------
def lstm_mfcc_forward(x, slab, *, meta):
    """x: (T, mfcc_dim) f32.  Returns PADDED (T, tag_pad) log-probs; the real
    tags are columns [:target_dim] (sliced at the consumer to keep the kernel
    store lane-dense and avoid an extra XLA copy here)."""
    T = x.shape[0]
    H, G, tag_pad = meta["H"], meta["G"], meta["tag_pad"]

    vmem = pl.BlockSpec(memory_space=pltpu.MemorySpace.VMEM)
    cost = pl.CostEstimate(
        flops=2 * T * meta["mfcc_dim"] * G + T * 3 * 2 * H * G
              + 2 * T * H * tag_pad,
        transcendentals=T * (2 * G + 2 * H) + T * tag_pad + T,
        bytes_accessed=4 * (x.size + slab.size + T * tag_pad),
    )

    return pl.pallas_call(
        _make_kernel(meta),
        out_shape=jax.ShapeDtypeStruct((T, tag_pad), jnp.float32),
        in_specs=[vmem, vmem],
        out_specs=pl.BlockSpec(memory_space=pltpu.MemorySpace.VMEM),
        scratch_shapes=[pltpu.VMEM((T, G), jnp.float32),   # xg0 (input proj)
                        pltpu.VMEM((T, H), jnp.float32)],  # h2 history
        cost_estimate=cost,
    )(x, slab)


# ---------------------------------------------------------------------------
# Synthetic params + pure-JAX reference (validation)
# ---------------------------------------------------------------------------
def init_params(key, mfcc_dim, hidden_dim, target_dim):
    """Deterministic synthetic params mirroring nn.LSTM / nn.Linear shapes,
    pre-transposed to (in, out); the two LSTM biases per layer are summed."""
    ks = jax.random.split(key, 10)
    H = hidden_dim
    s = 1.0 / jnp.sqrt(H)

    def u(k, shape):
        return jax.random.uniform(k, shape, jnp.float32, -s, s)

    w_ih0 = u(ks[0], (4 * H, mfcc_dim))
    w_hh0 = u(ks[1], (4 * H, H))
    b0 = u(ks[2], (4 * H,)) + u(ks[3], (4 * H,))
    w_ih1 = u(ks[4], (4 * H, H))
    w_hh1 = u(ks[5], (4 * H, H))
    b1 = u(ks[6], (4 * H,)) + u(ks[7], (4 * H,))
    w_out = u(ks[8], (target_dim, H))
    b_out = u(ks[9], (target_dim,))

    return {
        "wih0_t": w_ih0.T, "whh0_t": w_hh0.T, "b0": b0.reshape(1, 4 * H),
        "wih1_t": w_ih1.T, "whh1_t": w_hh1.T, "b1": b1.reshape(1, 4 * H),
        "wout_t": w_out.T, "bout": b_out.reshape(1, target_dim),
    }


def reference_forward(x, params):
    """Pure-JAX reference of the PyTorch forward (unscaled params)."""
    H = params["whh0_t"].shape[0]

    def cell(x_row, h, c, w_ih_t, w_hh_t, b):
        g = x_row @ w_ih_t + h @ w_hh_t + b
        i = jax.nn.sigmoid(g[:, 0 * H:1 * H])
        f = jax.nn.sigmoid(g[:, 1 * H:2 * H])
        gg = jnp.tanh(g[:, 2 * H:3 * H])
        o = jax.nn.sigmoid(g[:, 3 * H:4 * H])
        c = f * c + i * gg
        h = o * jnp.tanh(c)
        return h, c

    def scan_step(carry, x_t):
        h1, c1, h2, c2 = carry
        x_row = x_t[None, :]
        h1, c1 = cell(x_row, h1, c1, params["wih0_t"], params["whh0_t"], params["b0"])
        h2, c2 = cell(h1, h2, c2, params["wih1_t"], params["whh1_t"], params["b1"])
        tag = h2 @ params["wout_t"] + params["bout"]
        return (h1, c1, h2, c2), jax.nn.log_softmax(tag, axis=-1)[0]

    z = jnp.zeros((1, H), jnp.float32)
    _, out = lax.scan(scan_step, (z, z, z, z), x)
    return out


if __name__ == "__main__":
    # Small shapes consistent with the module: seq=8, mfcc_dim=16,
    # hidden_dim=32, target_dim=8 (batch is fixed to 1 by the module).
    T, mfcc_dim, hidden_dim, target_dim = 8, 16, 32, 8

    key = jax.random.PRNGKey(0)
    k_x, k_p = jax.random.split(key)
    x = jax.random.normal(k_x, (T, mfcc_dim), jnp.float32)
    params = init_params(k_p, mfcc_dim, hidden_dim, target_dim)

    slab, meta = pack_params(params, target_dim)      # once, outside jit
    fwd = jax.jit(functools.partial(lstm_mfcc_forward, meta=meta))

    out_padded = jax.block_until_ready(fwd(x, slab))
    out = out_padded[:, :target_dim]                  # slice at the consumer

    ref = jax.block_until_ready(reference_forward(x, params))
    assert out.shape == (T, target_dim)
    err = jnp.max(jnp.abs(out - ref))
    assert jnp.allclose(out, ref, rtol=5e-5, atol=5e-5), f"max abs err {err}"

    print("KERNEL_OK")
</pallas_src>

<mosaic_0001>
module attributes {stable_mosaic.version = 11 : i64} {
  func.func @kernel(%arg0: memref<8x16xf32, #tpu.memory_space<vmem>>, %arg1: memref<168x128xf32, #tpu.memory_space<vmem>>, %arg2: memref<8x128xf32, #tpu.memory_space<vmem>>, %arg3: memref<8x128xf32, #tpu.memory_space<vmem>>, %arg4: memref<8x32xf32, #tpu.memory_space<vmem>>) attributes {dimension_semantics = [], scalar_prefetch = 0 : i64, scratch_operands = 2 : i64, tpu.core_type = #tpu.core_type<tc>} {
    %c0 = arith.constant 0 : index
    %c0_0 = arith.constant 0 : index
    %0 = vector.load %arg1[%c0, %c0_0] : memref<168x128xf32, #tpu.memory_space<vmem>>, vector<16x128xf32>
    %c16 = arith.constant 16 : index
    %c0_1 = arith.constant 0 : index
    %1 = vector.load %arg1[%c16, %c0_1] : memref<168x128xf32, #tpu.memory_space<vmem>>, vector<32x128xf32>
    %c48 = arith.constant 48 : index
    %c0_2 = arith.constant 0 : index
    %2 = vector.load %arg1[%c48, %c0_2] : memref<168x128xf32, #tpu.memory_space<vmem>>, vector<1x128xf32>
    %c56 = arith.constant 56 : index
    %c0_3 = arith.constant 0 : index
    %3 = vector.load %arg1[%c56, %c0_3] : memref<168x128xf32, #tpu.memory_space<vmem>>, vector<32x128xf32>
    %c88 = arith.constant 88 : index
    %c0_4 = arith.constant 0 : index
    %4 = vector.load %arg1[%c88, %c0_4] : memref<168x128xf32, #tpu.memory_space<vmem>>, vector<32x128xf32>
    %c120 = arith.constant 120 : index
    %c0_5 = arith.constant 0 : index
    %5 = vector.load %arg1[%c120, %c0_5] : memref<168x128xf32, #tpu.memory_space<vmem>>, vector<1x128xf32>
    %c0_6 = arith.constant 0 : index
    %c0_7 = arith.constant 0 : index
    %6 = vector.load %arg0[%c0_6, %c0_7] : memref<8x16xf32, #tpu.memory_space<vmem>>, vector<8x16xf32>
    %cst = arith.constant dense<0.000000e+00> : vector<8x128xf32>
    %7 = tpu.matmul %6, %0, %cst {dimension_numbers = #tpu.dot_dimension_numbers<[1], [0], [0], [1], [0, 0, 1, 1], [], []>} : vector<8x16xf32>, vector<16x128xf32>, vector<8x128xf32> -> vector<8x128xf32>
    %8 = vector.broadcast %2 : vector<1x128xf32> to vector<8x128xf32>
    %9 = arith.addf %7, %8 : vector<8x128xf32>
    %c0_8 = arith.constant 0 : index
    %c0_9 = arith.constant 0 : index
    %10 = vector.load %arg3[%c0_8, %c0_9] : memref<8x128xf32, #tpu.memory_space<vmem>>, vector<8x128xf32>
    tpu.vector_store %arg3[%c0_8, %c0_9], %9 {strides = array<i32>} : memref<8x128xf32, #tpu.memory_space<vmem>>, vector<8x128xf32>,
    %cst_10 = arith.constant 0.000000e+00 : f32
    %11 = vector.broadcast %cst_10 : f32 to vector<1x32xf32>
    %c0_i32 = arith.constant 0 : i32
    %cst_11 = arith.constant dense<0.000000e+00> : vector<1x128xf32>
    %12 = tpu.matmul %11, %4, %cst_11 {dimension_numbers = #tpu.dot_dimension_numbers<[1], [0], [0], [1], [0, 0, 1, 1], [], []>} : vector<1x32xf32>, vector<32x128xf32>, vector<1x128xf32> -> vector<1x128xf32>
    %13 = arith.addf %12, %5 : vector<1x128xf32>
    %14 = arith.index_cast %c0_i32 : i32 to index
    %c0_12 = arith.constant 0 : index
    %15 = vector.load %arg3[%14, %c0_12] : memref<8x128xf32, #tpu.memory_space<vmem>>, vector<1x128xf32>
    %cst_13 = arith.constant dense<0.000000e+00> : vector<1x128xf32>
    %16 = tpu.matmul %11, %1, %cst_13 {dimension_numbers = #tpu.dot_dimension_numbers<[1], [0], [0], [1], [0, 0, 1, 1], [], []>} : vector<1x32xf32>, vector<32x128xf32>, vector<1x128xf32> -> vector<1x128xf32>
    %17 = arith.addf %15, %16 : vector<1x128xf32>
    %18 = arith.negf %17 : vector<1x128xf32>
    %19 = math.exp %18 : vector<1x128xf32>
    %cst_14 = arith.constant 1.000000e+00 : f32
    %20 = vector.broadcast %cst_14 : f32 to vector<1x128xf32>
    %21 = arith.addf %20, %19 : vector<1x128xf32>
    %22 = arith.divf %20, %21 : vector<1x128xf32>
    %23 = vector.extract_strided_slice %22 {offsets = [0, 64], sizes = [1, 32], strides = [1, 1]} : vector<1x128xf32> to vector<1x32xf32>
    %cst_15 = arith.constant 2.000000e+00 : f32
    %24 = vector.broadcast %cst_15 : f32 to vector<1x32xf32>
    %25 = arith.mulf %24, %23 : vector<1x32xf32>
    %cst_16 = arith.constant 1.000000e+00 : f32
    %26 = vector.broadcast %cst_16 : f32 to vector<1x32xf32>
    %27 = arith.subf %25, %26 : vector<1x32xf32>
    %28 = vector.extract_strided_slice %22 {offsets = [0, 32], sizes = [1, 32], strides = [1, 1]} : vector<1x128xf32> to vector<1x32xf32>
    %29 = arith.mulf %28, %11 : vector<1x32xf32>
    %30 = vector.extract_strided_slice %22 {offsets = [0, 0], sizes = [1, 32], strides = [1, 1]} : vector<1x128xf32> to vector<1x32xf32>
    %31 = arith.mulf %30, %27 : vector<1x32xf32>
    %32 = arith.addf %29, %31 : vector<1x32xf32>
    %33 = vector.extract_strided_slice %22 {offsets = [0, 96], sizes = [1, 32], strides = [1, 1]} : vector<1x128xf32> to vector<1x32xf32>
    %34 = math.tanh %32 : vector<1x32xf32>
    %35 = arith.mulf %33, %34 : vector<1x32xf32>
    %cst_17 = arith.constant dense<0.000000e+00> : vector<1x128xf32>
    %36 = tpu.matmul %35, %3, %cst_17 {dimension_numbers = #tpu.dot_dimension_numbers<[1], [0], [0], [1], [0, 0, 1, 1], [], []>} : vector<1x32xf32>, vector<32x128xf32>, vector<1x128xf32> -> vector<1x128xf32>
    %37 = arith.addf %13, %36 : vector<1x128xf32>
    %38 = arith.negf %37 : vector<1x128xf32>
    %39 = math.exp %38 : vector<1x128xf32>
    %cst_18 = arith.constant 1.000000e+00 : f32
    %40 = vector.broadcast %cst_18 : f32 to vector<1x128xf32>
    %41 = arith.addf %40, %39 : vector<1x128xf32>
    %42 = arith.divf %40, %41 : vector<1x128xf32>
    %43 = vector.extract_strided_slice %42 {offsets = [0, 64], sizes = [1, 32], strides = [1, 1]} : vector<1x128xf32> to vector<1x32xf32>
    %cst_19 = arith.constant 2.000000e+00 : f32
    %44 = vector.broadcast %cst_19 : f32 to vector<1x32xf32>
    %45 = arith.mulf %44, %43 : vector<1x32xf32>
    %cst_20 = arith.constant 1.000000e+00 : f32
    %46 = vector.broadcast %cst_20 : f32 to vector<1x32xf32>
    %47 = arith.subf %45, %46 : vector<1x32xf32>
    %48 = vector.extract_strided_slice %42 {offsets = [0, 32], sizes = [1, 32], strides = [1, 1]} : vector<1x128xf32> to vector<1x32xf32>
    %49 = arith.mulf %48, %11 : vector<1x32xf32>
    %50 = vector.extract_strided_slice %42 {offsets = [0, 0], sizes = [1, 32], strides = [1, 1]} : vector<1x128xf32> to vector<1x32xf32>
    %51 = arith.mulf %50, %47 : vector<1x32xf32>
    %52 = arith.addf %49, %51 : vector<1x32xf32>
    %53 = vector.extract_strided_slice %42 {offsets = [0, 96], sizes = [1, 32], strides = [1, 1]} : vector<1x128xf32> to vector<1x32xf32>
    %54 = math.tanh %52 : vector<1x32xf32>
    %55 = arith.mulf %53, %54 : vector<1x32xf32>
    %56 = arith.index_cast %c0_i32 : i32 to index
    %c0_21 = arith.constant 0 : index
    %57 = vector.load %arg4[%56, %c0_21] : memref<8x32xf32, #tpu.memory_space<vmem>>, vector<1x32xf32>
    tpu.vector_store %arg4[%56, %c0_21], %55 {strides = array<i32>} : memref<8x32xf32, #tpu.memory_space<vmem>>, vector<1x32xf32>,
    %c1_i32 = arith.constant 1 : i32
    %cst_22 = arith.constant dense<0.000000e+00> : vector<1x128xf32>
    %58 = tpu.matmul %55, %4, %cst_22 {dimension_numbers = #tpu.dot_dimension_numbers<[1], [0], [0], [1], [0, 0, 1, 1], [], []>} : vector<1x32xf32>, vector<32x128xf32>, vector<1x128xf32> -> vector<1x128xf32>
    %59 = arith.addf %58, %5 : vector<1x128xf32>
    %60 = arith.index_cast %c1_i32 : i32 to index
    %c0_23 = arith.constant 0 : index
    %61 = vector.load %arg3[%60, %c0_23] : memref<8x128xf32, #tpu.memory_space<vmem>>, vector<1x128xf32>
    %cst_24 = arith.constant dense<0.000000e+00> : vector<1x128xf32>
    %62 = tpu.matmul %35, %1, %cst_24 {dimension_numbers = #tpu.dot_dimension_numbers<[1], [0], [0], [1], [0, 0, 1, 1], [], []>} : vector<1x32xf32>, vector<32x128xf32>, vector<1x128xf32> -> vector<1x128xf32>
    %63 = arith.addf %61, %62 : vector<1x128xf32>
    %64 = arith.negf %63 : vector<1x128xf32>
    %65 = math.exp %64 : vector<1x128xf32>
    %cst_25 = arith.constant 1.000000e+00 : f32
    %66 = vector.broadcast %cst_25 : f32 to vector<1x128xf32>
    %67 = arith.addf %66, %65 : vector<1x128xf32>
    %68 = arith.divf %66, %67 : vector<1x128xf32>
    %69 = vector.extract_strided_slice %68 {offsets = [0, 64], sizes = [1, 32], strides = [1, 1]} : vector<1x128xf32> to vector<1x32xf32>
    %cst_26 = arith.constant 2.000000e+00 : f32
    %70 = vector.broadcast %cst_26 : f32 to vector<1x32xf32>
    %71 = arith.mulf %70, %69 : vector<1x32xf32>
    %cst_27 = arith.constant 1.000000e+00 : f32
    %72 = vector.broadcast %cst_27 : f32 to vector<1x32xf32>
    %73 = arith.subf %71, %72 : vector<1x32xf32>
    %74 = vector.extract_strided_slice %68 {offsets = [0, 32], sizes = [1, 32], strides = [1, 1]} : vector<1x128xf32> to vector<1x32xf32>
    %75 = arith.mulf %74, %32 : vector<1x32xf32>
    %76 = vector.extract_strided_slice %68 {offsets = [0, 0], sizes = [1, 32], strides = [1, 1]} : vector<1x128xf32> to vector<1x32xf32>
    %77 = arith.mulf %76, %73 : vector<1x32xf32>
    %78 = arith.addf %75, %77 : vector<1x32xf32>
    %79 = vector.extract_strided_slice %68 {offsets = [0, 96], sizes = [1, 32], strides = [1, 1]} : vector<1x128xf32> to vector<1x32xf32>
    %80 = math.tanh %78 : vector<1x32xf32>
    %81 = arith.mulf %79, %80 : vector<1x32xf32>
    %cst_28 = arith.constant dense<0.000000e+00> : vector<1x128xf32>
    %82 = tpu.matmul %81, %3, %cst_28 {dimension_numbers = #tpu.dot_dimension_numbers<[1], [0], [0], [1], [0, 0, 1, 1], [], []>} : vector<1x32xf32>, vector<32x128xf32>, vector<1x128xf32> -> vector<1x128xf32>
    %83 = arith.addf %59, %82 : vector<1x128xf32>
    %84 = arith.negf %83 : vector<1x128xf32>
    %85 = math.exp %84 : vector<1x128xf32>
    %cst_29 = arith.constant 1.000000e+00 : f32
    %86 = vector.broadcast %cst_29 : f32 to vector<1x128xf32>
    %87 = arith.addf %86, %85 : vector<1x128xf32>
    %88 = arith.divf %86, %87 : vector<1x128xf32>
    %89 = vector.extract_strided_slice %88 {offsets = [0, 64], sizes = [1, 32], strides = [1, 1]} : vector<1x128xf32> to vector<1x32xf32>
    %cst_30 = arith.constant 2.000000e+00 : f32
    %90 = vector.broadcast %cst_30 : f32 to vector<1x32xf32>
    %91 = arith.mulf %90, %89 : vector<1x32xf32>
    %cst_31 = arith.constant 1.000000e+00 : f32
    %92 = vector.broadcast %cst_31 : f32 to vector<1x32xf32>
    %93 = arith.subf %91, %92 : vector<1x32xf32>
    %94 = vector.extract_strided_slice %88 {offsets = [0, 32], sizes = [1, 32], strides = [1, 1]} : vector<1x128xf32> to vector<1x32xf32>
    %95 = arith.mulf %94, %52 : vector<1x32xf32>
    %96 = vector.extract_strided_slice %88 {offsets = [0, 0], sizes = [1, 32], strides = [1, 1]} : vector<1x128xf32> to vector<1x32xf32>
    %97 = arith.mulf %96, %93 : vector<1x32xf32>
    %98 = arith.addf %95, %97 : vector<1x32xf32>
    %99 = vector.extract_strided_slice %88 {offsets = [0, 96], sizes = [1, 32], strides = [1, 1]} : vector<1x128xf32> to vector<1x32xf32>
    %100 = math.tanh %98 : vector<1x32xf32>
    %101 = arith.mulf %99, %100 : vector<1x32xf32>
    %102 = arith.index_cast %c1_i32 : i32 to index
    %c0_32 = arith.constant 0 : index
    %103 = vector.load %arg4[%102, %c0_32] : memref<8x32xf32, #tpu.memory_space<vmem>>, vector<1x32xf32>
    tpu.vector_store %arg4[%102, %c0_32], %101 {strides = array<i32>} : memref<8x32xf32, #tpu.memory_space<vmem>>, vector<1x32xf32>,
    %c2_i32 = arith.constant 2 : i32
    %cst_33 = arith.constant dense<0.000000e+00> : vector<1x128xf32>
    %104 = tpu.matmul %101, %4, %cst_33 {dimension_numbers = #tpu.dot_dimension_numbers<[1], [0], [0], [1], [0, 0, 1, 1], [], []>} : vector<1x32xf32>, vector<32x128xf32>, vector<1x128xf32> -> vector<1x128xf32>
    %105 = arith.addf %104, %5 : vector<1x128xf32>
    %106 = arith.index_cast %c2_i32 : i32 to index
    %c0_34 = arith.constant 0 : index
    %107 = vector.load %arg3[%106, %c0_34] : memref<8x128xf32, #tpu.memory_space<vmem>>, vector<1x128xf32>
    %cst_35 = arith.constant dense<0.000000e+00> : vector<1x128xf32>
    %108 = tpu.matmul %81, %1, %cst_35 {dimension_numbers = #tpu.dot_dimension_numbers<[1], [0], [0], [1], [0, 0, 1, 1], [], []>} : vector<1x32xf32>, vector<32x128xf32>, vector<1x128xf32> -> vector<1x128xf32>
    %109 = arith.addf %107, %108 : vector<1x128xf32>
    %110 = arith.negf %109 : vector<1x128xf32>
    %111 = math.exp %110 : vector<1x128xf32>
    %cst_36 = arith.constant 1.000000e+00 : f32
    %112 = vector.broadcast %cst_36 : f32 to vector<1x128xf32>
    %113 = arith.addf %112, %111 : vector<1x128xf32>
    %114 = arith.divf %112, %113 : vector<1x128xf32>
    %115 = vector.extract_strided_slice %114 {offsets = [0, 64], sizes = [1, 32], strides = [1, 1]} : vector<1x128xf32> to vector<1x32xf32>
    %cst_37 = arith.constant 2.000000e+00 : f32
    %116 = vector.broadcast %cst_37 : f32 to vector<1x32xf32>
    %117 = arith.mulf %116, %115 : vector<1x32xf32>
    %cst_38 = arith.constant 1.000000e+00 : f32
    %118 = vector.broadcast %cst_38 : f32 to vector<1x32xf32>
    %119 = arith.subf %117, %118 : vector<1x32xf32>
    %120 = vector.extract_strided_slice %114 {offsets = [0, 32], sizes = [1, 32], strides = [1, 1]} : vector<1x128xf32> to vector<1x32xf32>
    %121 = arith.mulf %120, %78 : vector<1x32xf32>
    %122 = vector.extract_strided_slice %114 {offsets = [0, 0], sizes = [1, 32], strides = [1, 1]} : vector<1x128xf32> to vector<1x32xf32>
    %123 = arith.mulf %122, %119 : vector<1x32xf32>
    %124 = arith.addf %121, %123 : vector<1x32xf32>
    %125 = vector.extract_strided_slice %114 {offsets = [0, 96], sizes = [1, 32], strides = [1, 1]} : vector<1x128xf32> to vector<1x32xf32>
    %126 = math.tanh %124 : vector<1x32xf32>
    %127 = arith.mulf %125, %126 : vector<1x32xf32>
    %cst_39 = arith.constant dense<0.000000e+00> : vector<1x128xf32>
    %128 = tpu.matmul %127, %3, %cst_39 {dimension_numbers = #tpu.dot_dimension_numbers<[1], [0], [0], [1], [0, 0, 1, 1], [], []>} : vector<1x32xf32>, vector<32x128xf32>, vector<1x128xf32> -> vector<1x128xf32>
    %129 = arith.addf %105, %128 : vector<1x128xf32>
    %130 = arith.negf %129 : vector<1x128xf32>
    %131 = math.exp %130 : vector<1x128xf32>
    %cst_40 = arith.constant 1.000000e+00 : f32
    %132 = vector.broadcast %cst_40 : f32 to vector<1x128xf32>
    %133 = arith.addf %132, %131 : vector<1x128xf32>
    %134 = arith.divf %132, %133 : vector<1x128xf32>
    %135 = vector.extract_strided_slice %134 {offsets = [0, 64], sizes = [1, 32], strides = [1, 1]} : vector<1x128xf32> to vector<1x32xf32>
    %cst_41 = arith.constant 2.000000e+00 : f32
    %136 = vector.broadcast %cst_41 : f32 to vector<1x32xf32>
    %137 = arith.mulf %136, %135 : vector<1x32xf32>
    %cst_42 = arith.constant 1.000000e+00 : f32
    %138 = vector.broadcast %cst_42 : f32 to vector<1x32xf32>
    %139 = arith.subf %137, %138 : vector<1x32xf32>
    %140 = vector.extract_strided_slice %134 {offsets = [0, 32], sizes = [1, 32], strides = [1, 1]} : vector<1x128xf32> to vector<1x32xf32>
    %141 = arith.mulf %140, %98 : vector<1x32xf32>
    %142 = vector.extract_strided_slice %134 {offsets = [0, 0], sizes = [1, 32], strides = [1, 1]} : vector<1x128xf32> to vector<1x32xf32>
    %143 = arith.mulf %142, %139 : vector<1x32xf32>
    %144 = arith.addf %141, %143 : vector<1x32xf32>
    %145 = vector.extract_strided_slice %134 {offsets = [0, 96], sizes = [1, 32], strides = [1, 1]} : vector<1x128xf32> to vector<1x32xf32>
    %146 = math.tanh %144 : vector<1x32xf32>
    %147 = arith.mulf %145, %146 : vector<1x32xf32>
    %148 = arith.index_cast %c2_i32 : i32 to index
    %c0_43 = arith.constant 0 : index
    %149 = vector.load %arg4[%148, %c0_43] : memref<8x32xf32, #tpu.memory_space<vmem>>, vector<1x32xf32>
    tpu.vector_store %arg4[%148, %c0_43], %147 {strides = array<i32>} : memref<8x32xf32, #tpu.memory_space<vmem>>, vector<1x32xf32>,
    %c3_i32 = arith.constant 3 : i32
    %cst_44 = arith.constant dense<0.000000e+00> : vector<1x128xf32>
    %150 = tpu.matmul %147, %4, %cst_44 {dimension_numbers = #tpu.dot_dimension_numbers<[1], [0], [0], [1], [0, 0, 1, 1], [], []>} : vector<1x32xf32>, vector<32x128xf32>, vector<1x128xf32> -> vector<1x128xf32>
    %151 = arith.addf %150, %5 : vector<1x128xf32>
    %152 = arith.index_cast %c3_i32 : i32 to index
    %c0_45 = arith.constant 0 : index
    %153 = vector.load %arg3[%152, %c0_45] : memref<8x128xf32, #tpu.memory_space<vmem>>, vector<1x128xf32>
    %cst_46 = arith.constant dense<0.000000e+00> : vector<1x128xf32>
    %154 = tpu.matmul %127, %1, %cst_46 {dimension_numbers = #tpu.dot_dimension_numbers<[1], [0], [0], [1], [0, 0, 1, 1], [], []>} : vector<1x32xf32>, vector<32x128xf32>, vector<1x128xf32> -> vector<1x128xf32>
    %155 = arith.addf %153, %154 : vector<1x128xf32>
    %156 = arith.negf %155 : vector<1x128xf32>
    %157 = math.exp %156 : vector<1x128xf32>
    %cst_47 = arith.constant 1.000000e+00 : f32
    %158 = vector.broadcast %cst_47 : f32 to vector<1x128xf32>
    %159 = arith.addf %158, %157 : vector<1x128xf32>
    %160 = arith.divf %158, %159 : vector<1x128xf32>
    %161 = vector.extract_strided_slice %160 {offsets = [0, 64], sizes = [1, 32], strides = [1, 1]} : vector<1x128xf32> to vector<1x32xf32>
    %cst_48 = arith.constant 2.000000e+00 : f32
    %162 = vector.broadcast %cst_48 : f32 to vector<1x32xf32>
    %163 = arith.mulf %162, %161 : vector<1x32xf32>
    %cst_49 = arith.constant 1.000000e+00 : f32
    %164 = vector.broadcast %cst_49 : f32 to vector<1x32xf32>
    %165 = arith.subf %163, %164 : vector<1x32xf32>
    %166 = vector.extract_strided_slice %160 {offsets = [0, 32], sizes = [1, 32], strides = [1, 1]} : vector<1x128xf32> to vector<1x32xf32>
    %167 = arith.mulf %166, %124 : vector<1x32xf32>
    %168 = vector.extract_strided_slice %160 {offsets = [0, 0], sizes = [1, 32], strides = [1, 1]} : vector<1x128xf32> to vector<1x32xf32>
    %169 = arith.mulf %168, %165 : vector<1x32xf32>
    %170 = arith.addf %167, %169 : vector<1x32xf32>
    %171 = vector.extract_strided_slice %160 {offsets = [0, 96], sizes = [1, 32], strides = [1, 1]} : vector<1x128xf32> to vector<1x32xf32>
    %172 = math.tanh %170 : vector<1x32xf32>
    %173 = arith.mulf %171, %172 : vector<1x32xf32>
    %cst_50 = arith.constant dense<0.000000e+00> : vector<1x128xf32>
    %174 = tpu.matmul %173, %3, %cst_50 {dimension_numbers = #tpu.dot_dimension_numbers<[1], [0], [0], [1], [0, 0, 1, 1], [], []>} : vector<1x32xf32>, vector<32x128xf32>, vector<1x128xf32> -> vector<1x128xf32>
    %175 = arith.addf %151, %174 : vector<1x128xf32>
    %176 = arith.negf %175 : vector<1x128xf32>
    %177 = math.exp %176 : vector<1x128xf32>
    %cst_51 = arith.constant 1.000000e+00 : f32
    %178 = vector.broadcast %cst_51 : f32 to vector<1x128xf32>
    %179 = arith.addf %178, %177 : vector<1x128xf32>
    %180 = arith.divf %178, %179 : vector<1x128xf32>
    %181 = vector.extract_strided_slice %180 {offsets = [0, 64], sizes = [1, 32], strides = [1, 1]} : vector<1x128xf32> to vector<1x32xf32>
    %cst_52 = arith.constant 2.000000e+00 : f32
    %182 = vector.broadcast %cst_52 : f32 to vector<1x32xf32>
    %183 = arith.mulf %182, %181 : vector<1x32xf32>
    %cst_53 = arith.constant 1.000000e+00 : f32
    %184 = vector.broadcast %cst_53 : f32 to vector<1x32xf32>
    %185 = arith.subf %183, %184 : vector<1x32xf32>
    %186 = vector.extract_strided_slice %180 {offsets = [0, 32], sizes = [1, 32], strides = [1, 1]} : vector<1x128xf32> to vector<1x32xf32>
    %187 = arith.mulf %186, %144 : vector<1x32xf32>
    %188 = vector.extract_strided_slice %180 {offsets = [0, 0], sizes = [1, 32], strides = [1, 1]} : vector<1x128xf32> to vector<1x32xf32>
    %189 = arith.mulf %188, %185 : vector<1x32xf32>
    %190 = arith.addf %187, %189 : vector<1x32xf32>
    %191 = vector.extract_strided_slice %180 {offsets = [0, 96], sizes = [1, 32], strides = [1, 1]} : vector<1x128xf32> to vector<1x32xf32>
    %192 = math.tanh %190 : vector<1x32xf32>
    %193 = arith.mulf %191, %192 : vector<1x32xf32>
    %194 = arith.index_cast %c3_i32 : i32 to index
    %c0_54 = arith.constant 0 : index
    %195 = vector.load %arg4[%194, %c0_54] : memref<8x32xf32, #tpu.memory_space<vmem>>, vector<1x32xf32>
    tpu.vector_store %arg4[%194, %c0_54], %193 {strides = array<i32>} : memref<8x32xf32, #tpu.memory_space<vmem>>, vector<1x32xf32>,
    %c4_i32 = arith.constant 4 : i32
    %cst_55 = arith.constant dense<0.000000e+00> : vector<1x128xf32>
    %196 = tpu.matmul %193, %4, %cst_55 {dimension_numbers = #tpu.dot_dimension_numbers<[1], [0], [0], [1], [0, 0, 1, 1], [], []>} : vector<1x32xf32>, vector<32x128xf32>, vector<1x128xf32> -> vector<1x128xf32>
    %197 = arith.addf %196, %5 : vector<1x128xf32>
    %198 = arith.index_cast %c4_i32 : i32 to index
    %c0_56 = arith.constant 0 : index
    %199 = vector.load %arg3[%198, %c0_56] : memref<8x128xf32, #tpu.memory_space<vmem>>, vector<1x128xf32>
    %cst_57 = arith.constant dense<0.000000e+00> : vector<1x128xf32>
    %200 = tpu.matmul %173, %1, %cst_57 {dimension_numbers = #tpu.dot_dimension_numbers<[1], [0], [0], [1], [0, 0, 1, 1], [], []>} : vector<1x32xf32>, vector<32x128xf32>, vector<1x128xf32> -> vector<1x128xf32>
    %201 = arith.addf %199, %200 : vector<1x128xf32>
    %202 = arith.negf %201 : vector<1x128xf32>
    %203 = math.exp %202 : vector<1x128xf32>
    %cst_58 = arith.constant 1.000000e+00 : f32
    %204 = vector.broadcast %cst_58 : f32 to vector<1x128xf32>
    %205 = arith.addf %204, %203 : vector<1x128xf32>
    %206 = arith.divf %204, %205 : vector<1x128xf32>
    %207 = vector.extract_strided_slice %206 {offsets = [0, 64], sizes = [1, 32], strides = [1, 1]} : vector<1x128xf32> to vector<1x32xf32>
    %cst_59 = arith.constant 2.000000e+00 : f32
    %208 = vector.broadcast %cst_59 : f32 to vector<1x32xf32>
    %209 = arith.mulf %208, %207 : vector<1x32xf32>
    %cst_60 = arith.constant 1.000000e+00 : f32
    %210 = vector.broadcast %cst_60 : f32 to vector<1x32xf32>
    %211 = arith.subf %209, %210 : vector<1x32xf32>
    %212 = vector.extract_strided_slice %206 {offsets = [0, 32], sizes = [1, 32], strides = [1, 1]} : vector<1x128xf32> to vector<1x32xf32>
    %213 = arith.mulf %212, %170 : vector<1x32xf32>
    %214 = vector.extract_strided_slice %206 {offsets = [0, 0], sizes = [1, 32], strides = [1, 1]} : vector<1x128xf32> to vector<1x32xf32>
    %215 = arith.mulf %214, %211 : vector<1x32xf32>
    %216 = arith.addf %213, %215 : vector<1x32xf32>
    %217 = vector.extract_strided_slice %206 {offsets = [0, 96], sizes = [1, 32], strides = [1, 1]} : vector<1x128xf32> to vector<1x32xf32>
    %218 = math.tanh %216 : vector<1x32xf32>
    %219 = arith.mulf %217, %218 : vector<1x32xf32>
    %cst_61 = arith.constant dense<0.000000e+00> : vector<1x128xf32>
    %220 = tpu.matmul %219, %3, %cst_61 {dimension_numbers = #tpu.dot_dimension_numbers<[1], [0], [0], [1], [0, 0, 1, 1], [], []>} : vector<1x32xf32>, vector<32x128xf32>, vector<1x128xf32> -> vector<1x128xf32>
    %221 = arith.addf %197, %220 : vector<1x128xf32>
    %222 = arith.negf %221 : vector<1x128xf32>
    %223 = math.exp %222 : vector<1x128xf32>
    %cst_62 = arith.constant 1.000000e+00 : f32
    %224 = vector.broadcast %cst_62 : f32 to vector<1x128xf32>
    %225 = arith.addf %224, %223 : vector<1x128xf32>
    %226 = arith.divf %224, %225 : vector<1x128xf32>
    %227 = vector.extract_strided_slice %226 {offsets = [0, 64], sizes = [1, 32], strides = [1, 1]} : vector<1x128xf32> to vector<1x32xf32>
    %cst_63 = arith.constant 2.000000e+00 : f32
    %228 = vector.broadcast %cst_63 : f32 to vector<1x32xf32>
    %229 = arith.mulf %228, %227 : vector<1x32xf32>
    %cst_64 = arith.constant 1.000000e+00 : f32
    %230 = vector.broadcast %cst_64 : f32 to vector<1x32xf32>
    %231 = arith.subf %229, %230 : vector<1x32xf32>
    %232 = vector.extract_strided_slice %226 {offsets = [0, 32], sizes = [1, 32], strides = [1, 1]} : vector<1x128xf32> to vector<1x32xf32>
    %233 = arith.mulf %232, %190 : vector<1x32xf32>
    %234 = vector.extract_strided_slice %226 {offsets = [0, 0], sizes = [1, 32], strides = [1, 1]} : vector<1x128xf32> to vector<1x32xf32>
    %235 = arith.mulf %234, %231 : vector<1x32xf32>
    %236 = arith.addf %233, %235 : vector<1x32xf32>
    %237 = vector.extract_strided_slice %226 {offsets = [0, 96], sizes = [1, 32], strides = [1, 1]} : vector<1x128xf32> to vector<1x32xf32>
    %238 = math.tanh %236 : vector<1x32xf32>
    %239 = arith.mulf %237, %238 : vector<1x32xf32>
    %240 = arith.index_cast %c4_i32 : i32 to index
    %c0_65 = arith.constant 0 : index
    %241 = vector.load %arg4[%240, %c0_65] : memref<8x32xf32, #tpu.memory_space<vmem>>, vector<1x32xf32>
    tpu.vector_store %arg4[%240, %c0_65], %239 {strides = array<i32>} : memref<8x32xf32, #tpu.memory_space<vmem>>, vector<1x32xf32>,
    %c5_i32 = arith.constant 5 : i32
    %cst_66 = arith.constant dense<0.000000e+00> : vector<1x128xf32>
    %242 = tpu.matmul %239, %4, %cst_66 {dimension_numbers = #tpu.dot_dimension_numbers<[1], [0], [0], [1], [0, 0, 1, 1], [], []>} : vector<1x32xf32>, vector<32x128xf32>, vector<1x128xf32> -> vector<1x128xf32>
    %243 = arith.addf %242, %5 : vector<1x128xf32>
    %244 = arith.index_cast %c5_i32 : i32 to index
    %c0_67 = arith.constant 0 : index
    %245 = vector.load %arg3[%244, %c0_67] : memref<8x128xf32, #tpu.memory_space<vmem>>, vector<1x128xf32>
    %cst_68 = arith.constant dense<0.000000e+00> : vector<1x128xf32>
    %246 = tpu.matmul %219, %1, %cst_68 {dimension_numbers = #tpu.dot_dimension_numbers<[1], [0], [0], [1], [0, 0, 1, 1], [], []>} : vector<1x32xf32>, vector<32x128xf32>, vector<1x128xf32> -> vector<1x128xf32>
    %247 = arith.addf %245, %246 : vector<1x128xf32>
    %248 = arith.negf %247 : vector<1x128xf32>
    %249 = math.exp %248 : vector<1x128xf32>
    %cst_69 = arith.constant 1.000000e+00 : f32
    %250 = vector.broadcast %cst_69 : f32 to vector<1x128xf32>
    %251 = arith.addf %250, %249 : vector<1x128xf32>
    %252 = arith.divf %250, %251 : vector<1x128xf32>
    %253 = vector.extract_strided_slice %252 {offsets = [0, 64], sizes = [1, 32], strides = [1, 1]} : vector<1x128xf32> to vector<1x32xf32>
    %cst_70 = arith.constant 2.000000e+00 : f32
    %254 = vector.broadcast %cst_70 : f32 to vector<1x32xf32>
    %255 = arith.mulf %254, %253 : vector<1x32xf32>
    %cst_71 = arith.constant 1.000000e+00 : f32
    %256 = vector.broadcast %cst_71 : f32 to vector<1x32xf32>
    %257 = arith.subf %255, %256 : vector<1x32xf32>
    %258 = vector.extract_strided_slice %252 {offsets = [0, 32], sizes = [1, 32], strides = [1, 1]} : vector<1x128xf32> to vector<1x32xf32>
    %259 = arith.mulf %258, %216 : vector<1x32xf32>
    %260 = vector.extract_strided_slice %252 {offsets = [0, 0], sizes = [1, 32], strides = [1, 1]} : vector<1x128xf32> to vector<1x32xf32>
    %261 = arith.mulf %260, %257 : vector<1x32xf32>
    %262 = arith.addf %259, %261 : vector<1x32xf32>
    %263 = vector.extract_strided_slice %252 {offsets = [0, 96], sizes = [1, 32], strides = [1, 1]} : vector<1x128xf32> to vector<1x32xf32>
    %264 = math.tanh %262 : vector<1x32xf32>
    %265 = arith.mulf %263, %264 : vector<1x32xf32>
    %cst_72 = arith.constant dense<0.000000e+00> : vector<1x128xf32>
    %266 = tpu.matmul %265, %3, %cst_72 {dimension_numbers = #tpu.dot_dimension_numbers<[1], [0], [0], [1], [0, 0, 1, 1], [], []>} : vector<1x32xf32>, vector<32x128xf32>, vector<1x128xf32> -> vector<1x128xf32>
    %267 = arith.addf %243, %266 : vector<1x128xf32>
    %268 = arith.negf %267 : vector<1x128xf32>
    %269 = math.exp %268 : vector<1x128xf32>
    %cst_73 = arith.constant 1.000000e+00 : f32
    %270 = vector.broadcast %cst_73 : f32 to vector<1x128xf32>
    %271 = arith.addf %270, %269 : vector<1x128xf32>
    %272 = arith.divf %270, %271 : vector<1x128xf32>
    %273 = vector.extract_strided_slice %272 {offsets = [0, 64], sizes = [1, 32], strides = [1, 1]} : vector<1x128xf32> to vector<1x32xf32>
    %cst_74 = arith.constant 2.000000e+00 : f32
    %274 = vector.broadcast %cst_74 : f32 to vector<1x32xf32>
    %275 = arith.mulf %274, %273 : vector<1x32xf32>
    %cst_75 = arith.constant 1.000000e+00 : f32
    %276 = vector.broadcast %cst_75 : f32 to vector<1x32xf32>
    %277 = arith.subf %275, %276 : vector<1x32xf32>
    %278 = vector.extract_strided_slice %272 {offsets = [0, 32], sizes = [1, 32], strides = [1, 1]} : vector<1x128xf32> to vector<1x32xf32>
    %279 = arith.mulf %278, %236 : vector<1x32xf32>
    %280 = vector.extract_strided_slice %272 {offsets = [0, 0], sizes = [1, 32], strides = [1, 1]} : vector<1x128xf32> to vector<1x32xf32>
    %281 = arith.mulf %280, %277 : vector<1x32xf32>
    %282 = arith.addf %279, %281 : vector<1x32xf32>
    %283 = vector.extract_strided_slice %272 {offsets = [0, 96], sizes = [1, 32], strides = [1, 1]} : vector<1x128xf32> to vector<1x32xf32>
    %284 = math.tanh %282 : vector<1x32xf32>
    %285 = arith.mulf %283, %284 : vector<1x32xf32>
    %286 = arith.index_cast %c5_i32 : i32 to index
    %c0_76 = arith.constant 0 : index
    %287 = vector.load %arg4[%286, %c0_76] : memref<8x32xf32, #tpu.memory_space<vmem>>, vector<1x32xf32>
    tpu.vector_store %arg4[%286, %c0_76], %285 {strides = array<i32>} : memref<8x32xf32, #tpu.memory_space<vmem>>, vector<1x32xf32>,
    %c6_i32 = arith.constant 6 : i32
    %cst_77 = arith.constant dense<0.000000e+00> : vector<1x128xf32>
    %288 = tpu.matmul %285, %4, %cst_77 {dimension_numbers = #tpu.dot_dimension_numbers<[1], [0], [0], [1], [0, 0, 1, 1], [], []>} : vector<1x32xf32>, vector<32x128xf32>, vector<1x128xf32> -> vector<1x128xf32>
    %289 = arith.addf %288, %5 : vector<1x128xf32>
    %290 = arith.index_cast %c6_i32 : i32 to index
    %c0_78 = arith.constant 0 : index
    %291 = vector.load %arg3[%290, %c0_78] : memref<8x128xf32, #tpu.memory_space<vmem>>, vector<1x128xf32>
    %cst_79 = arith.constant dense<0.000000e+00> : vector<1x128xf32>
    %292 = tpu.matmul %265, %1, %cst_79 {dimension_numbers = #tpu.dot_dimension_numbers<[1], [0], [0], [1], [0, 0, 1, 1], [], []>} : vector<1x32xf32>, vector<32x128xf32>, vector<1x128xf32> -> vector<1x128xf32>
    %293 = arith.addf %291, %292 : vector<1x128xf32>
    %294 = arith.negf %293 : vector<1x128xf32>
    %295 = math.exp %294 : vector<1x128xf32>
    %cst_80 = arith.constant 1.000000e+00 : f32
    %296 = vector.broadcast %cst_80 : f32 to vector<1x128xf32>
    %297 = arith.addf %296, %295 : vector<1x128xf32>
    %298 = arith.divf %296, %297 : vector<1x128xf32>
    %299 = vector.extract_strided_slice %298 {offsets = [0, 64], sizes = [1, 32], strides = [1, 1]} : vector<1x128xf32> to vector<1x32xf32>
    %cst_81 = arith.constant 2.000000e+00 : f32
    %300 = vector.broadcast %cst_81 : f32 to vector<1x32xf32>
    %301 = arith.mulf %300, %299 : vector<1x32xf32>
    %cst_82 = arith.constant 1.000000e+00 : f32
    %302 = vector.broadcast %cst_82 : f32 to vector<1x32xf32>
    %303 = arith.subf %301, %302 : vector<1x32xf32>
    %304 = vector.extract_strided_slice %298 {offsets = [0, 32], sizes = [1, 32], strides = [1, 1]} : vector<1x128xf32> to vector<1x32xf32>
    %305 = arith.mulf %304, %262 : vector<1x32xf32>
    %306 = vector.extract_strided_slice %298 {offsets = [0, 0], sizes = [1, 32], strides = [1, 1]} : vector<1x128xf32> to vector<1x32xf32>
    %307 = arith.mulf %306, %303 : vector<1x32xf32>
    %308 = arith.addf %305, %307 : vector<1x32xf32>
    %309 = vector.extract_strided_slice %298 {offsets = [0, 96], sizes = [1, 32], strides = [1, 1]} : vector<1x128xf32> to vector<1x32xf32>
    %310 = math.tanh %308 : vector<1x32xf32>
    %311 = arith.mulf %309, %310 : vector<1x32xf32>
    %cst_83 = arith.constant dense<0.000000e+00> : vector<1x128xf32>
    %312 = tpu.matmul %311, %3, %cst_83 {dimension_numbers = #tpu.dot_dimension_numbers<[1], [0], [0], [1], [0, 0, 1, 1], [], []>} : vector<1x32xf32>, vector<32x128xf32>, vector<1x128xf32> -> vector<1x128xf32>
    %313 = arith.addf %289, %312 : vector<1x128xf32>
    %314 = arith.negf %313 : vector<1x128xf32>
    %315 = math.exp %314 : vector<1x128xf32>
    %cst_84 = arith.constant 1.000000e+00 : f32
    %316 = vector.broadcast %cst_84 : f32 to vector<1x128xf32>
    %317 = arith.addf %316, %315 : vector<1x128xf32>
    %318 = arith.divf %316, %317 : vector<1x128xf32>
    %319 = vector.extract_strided_slice %318 {offsets = [0, 64], sizes = [1, 32], strides = [1, 1]} : vector<1x128xf32> to vector<1x32xf32>
    %cst_85 = arith.constant 2.000000e+00 : f32
    %320 = vector.broadcast %cst_85 : f32 to vector<1x32xf32>
    %321 = arith.mulf %320, %319 : vector<1x32xf32>
    %cst_86 = arith.constant 1.000000e+00 : f32
    %322 = vector.broadcast %cst_86 : f32 to vector<1x32xf32>
    %323 = arith.subf %321, %322 : vector<1x32xf32>
    %324 = vector.extract_strided_slice %318 {offsets = [0, 32], sizes = [1, 32], strides = [1, 1]} : vector<1x128xf32> to vector<1x32xf32>
    %325 = arith.mulf %324, %282 : vector<1x32xf32>
    %326 = vector.extract_strided_slice %318 {offsets = [0, 0], sizes = [1, 32], strides = [1, 1]} : vector<1x128xf32> to vector<1x32xf32>
    %327 = arith.mulf %326, %323 : vector<1x32xf32>
    %328 = arith.addf %325, %327 : vector<1x32xf32>
    %329 = vector.extract_strided_slice %318 {offsets = [0, 96], sizes = [1, 32], strides = [1, 1]} : vector<1x128xf32> to vector<1x32xf32>
    %330 = math.tanh %328 : vector<1x32xf32>
    %331 = arith.mulf %329, %330 : vector<1x32xf32>
    %332 = arith.index_cast %c6_i32 : i32 to index
    %c0_87 = arith.constant 0 : index
    %333 = vector.load %arg4[%332, %c0_87] : memref<8x32xf32, #tpu.memory_space<vmem>>, vector<1x32xf32>
    tpu.vector_store %arg4[%332, %c0_87], %331 {strides = array<i32>} : memref<8x32xf32, #tpu.memory_space<vmem>>, vector<1x32xf32>,
    %c7_i32 = arith.constant 7 : i32
    %cst_88 = arith.constant dense<0.000000e+00> : vector<1x128xf32>
    %334 = tpu.matmul %331, %4, %cst_88 {dimension_numbers = #tpu.dot_dimension_numbers<[1], [0], [0], [1], [0, 0, 1, 1], [], []>} : vector<1x32xf32>, vector<32x128xf32>, vector<1x128xf32> -> vector<1x128xf32>
    %335 = arith.addf %334, %5 : vector<1x128xf32>
    %336 = arith.index_cast %c7_i32 : i32 to index
    %c0_89 = arith.constant 0 : index
    %337 = vector.load %arg3[%336, %c0_89] : memref<8x128xf32, #tpu.memory_space<vmem>>, vector<1x128xf32>
    %cst_90 = arith.constant dense<0.000000e+00> : vector<1x128xf32>
    %338 = tpu.matmul %311, %1, %cst_90 {dimension_numbers = #tpu.dot_dimension_numbers<[1], [0], [0], [1], [0, 0, 1, 1], [], []>} : vector<1x32xf32>, vector<32x128xf32>, vector<1x128xf32> -> vector<1x128xf32>
    %339 = arith.addf %337, %338 : vector<1x128xf32>
    %340 = arith.negf %339 : vector<1x128xf32>
    %341 = math.exp %340 : vector<1x128xf32>
    %cst_91 = arith.constant 1.000000e+00 : f32
    %342 = vector.broadcast %cst_91 : f32 to vector<1x128xf32>
    %343 = arith.addf %342, %341 : vector<1x128xf32>
    %344 = arith.divf %342, %343 : vector<1x128xf32>
    %345 = vector.extract_strided_slice %344 {offsets = [0, 64], sizes = [1, 32], strides = [1, 1]} : vector<1x128xf32> to vector<1x32xf32>
    %cst_92 = arith.constant 2.000000e+00 : f32
    %346 = vector.broadcast %cst_92 : f32 to vector<1x32xf32>
    %347 = arith.mulf %346, %345 : vector<1x32xf32>
    %cst_93 = arith.constant 1.000000e+00 : f32
    %348 = vector.broadcast %cst_93 : f32 to vector<1x32xf32>
    %349 = arith.subf %347, %348 : vector<1x32xf32>
    %350 = vector.extract_strided_slice %344 {offsets = [0, 32], sizes = [1, 32], strides = [1, 1]} : vector<1x128xf32> to vector<1x32xf32>
    %351 = arith.mulf %350, %308 : vector<1x32xf32>
    %352 = vector.extract_strided_slice %344 {offsets = [0, 0], sizes = [1, 32], strides = [1, 1]} : vector<1x128xf32> to vector<1x32xf32>
    %353 = arith.mulf %352, %349 : vector<1x32xf32>
    %354 = arith.addf %351, %353 : vector<1x32xf32>
    %355 = vector.extract_strided_slice %344 {offsets = [0, 96], sizes = [1, 32], strides = [1, 1]} : vector<1x128xf32> to vector<1x32xf32>
    %356 = math.tanh %354 : vector<1x32xf32>
    %357 = arith.mulf %355, %356 : vector<1x32xf32>
    %cst_94 = arith.constant dense<0.000000e+00> : vector<1x128xf32>
    %358 = tpu.matmul %357, %3, %cst_94 {dimension_numbers = #tpu.dot_dimension_numbers<[1], [0], [0], [1], [0, 0, 1, 1], [], []>} : vector<1x32xf32>, vector<32x128xf32>, vector<1x128xf32> -> vector<1x128xf32>
    %359 = arith.addf %335, %358 : vector<1x128xf32>
    %360 = arith.negf %359 : vector<1x128xf32>
    %361 = math.exp %360 : vector<1x128xf32>
    %cst_95 = arith.constant 1.000000e+00 : f32
    %362 = vector.broadcast %cst_95 : f32 to vector<1x128xf32>
    %363 = arith.addf %362, %361 : vector<1x128xf32>
    %364 = arith.divf %362, %363 : vector<1x128xf32>
    %365 = vector.extract_strided_slice %364 {offsets = [0, 64], sizes = [1, 32], strides = [1, 1]} : vector<1x128xf32> to vector<1x32xf32>
    %cst_96 = arith.constant 2.000000e+00 : f32
    %366 = vector.broadcast %cst_96 : f32 to vector<1x32xf32>
    %367 = arith.mulf %366, %365 : vector<1x32xf32>
    %cst_97 = arith.constant 1.000000e+00 : f32
    %368 = vector.broadcast %cst_97 : f32 to vector<1x32xf32>
    %369 = arith.subf %367, %368 : vector<1x32xf32>
    %370 = vector.extract_strided_slice %364 {offsets = [0, 32], sizes = [1, 32], strides = [1, 1]} : vector<1x128xf32> to vector<1x32xf32>
    %371 = arith.mulf %370, %328 : vector<1x32xf32>
    %372 = vector.extract_strided_slice %364 {offsets = [0, 0], sizes = [1, 32], strides = [1, 1]} : vector<1x128xf32> to vector<1x32xf32>
    %373 = arith.mulf %372, %369 : vector<1x32xf32>
    %374 = arith.addf %371, %373 : vector<1x32xf32>
    %375 = vector.extract_strided_slice %364 {offsets = [0, 96], sizes = [1, 32], strides = [1, 1]} : vector<1x128xf32> to vector<1x32xf32>
    %376 = math.tanh %374 : vector<1x32xf32>
    %377 = arith.mulf %375, %376 : vector<1x32xf32>
    %378 = arith.index_cast %c7_i32 : i32 to index
    %c0_98 = arith.constant 0 : index
    %379 = vector.load %arg4[%378, %c0_98] : memref<8x32xf32, #tpu.memory_space<vmem>>, vector<1x32xf32>
    tpu.vector_store %arg4[%378, %c0_98], %377 {strides = array<i32>} : memref<8x32xf32, #tpu.memory_space<vmem>>, vector<1x32xf32>,
    %c8_i32 = arith.constant 8 : i32
    %c128 = arith.constant 128 : index
    %c0_99 = arith.constant 0 : index
    %380 = vector.load %arg1[%c128, %c0_99] : memref<168x128xf32, #tpu.memory_space<vmem>>, vector<32x128xf32>
    %c160 = arith.constant 160 : index
    %c0_100 = arith.constant 0 : index
    %381 = vector.load %arg1[%c160, %c0_100] : memref<168x128xf32, #tpu.memory_space<vmem>>, vector<1x128xf32>
    %c0_101 = arith.constant 0 : index
    %c0_102 = arith.constant 0 : index
    %382 = vector.load %arg4[%c0_101, %c0_102] : memref<8x32xf32, #tpu.memory_space<vmem>>, vector<8x32xf32>
    %cst_103 = arith.constant dense<0.000000e+00> : vector<8x128xf32>
    %383 = tpu.matmul %382, %380, %cst_103 {dimension_numbers = #tpu.dot_dimension_numbers<[1], [0], [0], [1], [0, 0, 1, 1], [], []>} : vector<8x32xf32>, vector<32x128xf32>, vector<8x128xf32> -> vector<8x128xf32>
    %384 = vector.broadcast %381 : vector<1x128xf32> to vector<8x128xf32>
    %385 = arith.addf %383, %384 : vector<8x128xf32>
    %cst_104 = arith.constant dense<0xFF800000> : vector<8xf32>
    %386 = vector.multi_reduction <maximumf>, %385, %cst_104 [1] : vector<8x128xf32> to vector<8xf32>
    %387 = vector.shape_cast %386 : vector<8xf32> to vector<8x1xf32>
    %388 = vector.broadcast %387 : vector<8x1xf32> to vector<8x128xf32>
    %389 = arith.subf %385, %388 : vector<8x128xf32>
    %390 = math.exp %389 : vector<8x128xf32>
    %cst_105 = arith.constant dense<0.000000e+00> : vector<8xf32>
    %391 = vector.multi_reduction <add>, %390, %cst_105 [1] : vector<8x128xf32> to vector<8xf32>
    %392 = vector.shape_cast %391 : vector<8xf32> to vector<8x1xf32>
    %393 = math.log %392 : vector<8x1xf32>
    %394 = arith.addf %387, %393 : vector<8x1xf32>
    %395 = vector.broadcast %394 : vector<8x1xf32> to vector<8x128xf32>
    %396 = arith.subf %385, %395 : vector<8x128xf32>
    %c0_106 = arith.constant 0 : index
    %c0_107 = arith.constant 0 : index
    %397 = vector.load %arg2[%c0_106, %c0_107] : memref<8x128xf32, #tpu.memory_space<vmem>>, vector<8x128xf32>
    tpu.vector_store %arg2[%c0_106, %c0_107], %396 {strides = array<i32>} : memref<8x128xf32, #tpu.memory_space<vmem>>, vector<8x128xf32>,
    return
  }
}

</mosaic_0001>

<bundles_post_ra>
// kernel: lstm_mfcc_forward.1
= control target key start
LH: loop header
LB: loop body
LE: loop exit
PB: predicated region body
PF: predicated region fallthrough
CT: control target
= control target key end

     0   :  { %7 = vsyncpa [#allocation5], 0  ;;  %s3665_s0 = inlined_call_operand.hbm [shape: f32[8,16], index: 0, kind: input, shape index: {}]   ;;  %s3666_s1 = inlined_call_operand.hbm [shape: f32[168,128], index: 1, kind: input, shape index: {}]   ;;  %s3667_s2 = inlined_call_operand.hbm [shape: f32[8,128], index: 2, kind: output, shape index: {}]  }
   0x1   :  { %8 = vsyncpa [#allocation8], 0 }
   0x2   :  { %9 = vsyncpa [#allocation6], 0  ;;  %s3275_s9 = smov [#allocation4]   ;;  %s3276_s11 = smov [#allocation7]  }
   0x3   :  { %s16_s10 = sshll.u32 %s3275_s9, 4  ;;  %s25_s12 = sshll.u32 %s3276_s11, 4  ;;  %s17_s10 = int_to_ptr.vmem [resolvable:$true] %s16_s10  ;;  %s3300_s12 = int_to_ptr.vmem [resolvable:$true] %s25_s12 }
   0x4   :  { %s3203_s15 = scalar_lea.hbm %s3665_s0, 128 }
   0x5   :  { %p3204_p0 = scmp.ne.s32.totalorder %s3665_s0, %s3203_s15  ;;  %p3207_p1 = scmp.lt.u32.totalorder %s3203_s15, %s3665_s0 }
   0x7   :  { %p3209_p2 = pnand %p3207_p1, %p3204_p0 }
   0x9   :  { %3212 = shalt.err (!%p3209_p2)
}
   0xa   :  { %s3213_s20 = scalar_lea.vmem %s17_s10, 128  ;;  %p3218_p4 = scmp.lt.s32.totalorder %s17_s10, %s17_s10 }
   0xb   :  { %p3214_p3 = scmp.ne.s32.totalorder %s17_s10, %s3213_s20  ;;  %p3219_p5 = scmp.lt.s32.totalorder %s3213_s20, %s3213_s20 }
   0xd   :  { %p3220_p6 = por %p3219_p5, %p3218_p4 }
   0xf   :  { %p3221_p7 = pnand %p3220_p6, %p3214_p3 }
  0x11   :  { %3224 = shalt.err (!%p3221_p7)
}
  0x12   :  { %19 = dma.hbm_to_vmem [thread:$0]  %s3665_s0, 128, %s17_s10, [#allocation5]  }
  0x13   :  { %s3225_s25 = scalar_lea.hbm %s3666_s1, 2688 }
  0x14   :  { %p3226_p8 = scmp.ne.s32.totalorder %s3666_s1, %s3225_s25  ;;  %p3229_p9 = scmp.lt.u32.totalorder %s3225_s25, %s3666_s1 }
  0x16   :  { %p3231_p10 = pnand %p3229_p9, %p3226_p8 }
  0x18   :  { %3234 = shalt.err (!%p3231_p10)
}
  0x19   :  { %s3235_s30 = scalar_lea.vmem %s3300_s12, 2688  ;;  %p3240_p12 = scmp.lt.s32.totalorder %s3300_s12, %s3300_s12 }
  0x1a   :  { %p3236_p11 = scmp.ne.s32.totalorder %s3300_s12, %s3235_s30  ;;  %p3241_p13 = scmp.lt.s32.totalorder %s3235_s30, %s3235_s30 }
  0x1c   :  { %p3242_p0 = por %p3241_p13, %p3240_p12 }
  0x1e   :  { %p3243_p1 = pnand %p3242_p0, %p3236_p11 }
  0x20   :  { %3246 = shalt.err (!%p3243_p1)
}
  0x21   :  { %s3277_s0 = smov 128   ;;  %s3278_s3 = smov 8  }
  0x22   :  { %31 = dma.hbm_to_vmem [thread:$0]  %s3666_s1, 2688, %s3300_s12, [#allocation8], %s3277_s0, %s3277_s0, %s3278_s3  }
  0x23   :  { %3269 = dma.done.wait [#allocation5], 128  }
  0x24   :  { %3270 = vsyncadd [#allocation5], 4294967168 }
  0x25   :  { %3271 = dma.done.wait [#allocation8], 2688  }
  0x26   :  { %3272 = vsyncadd [#allocation8], 4294964608  ;;  %v3279_v0 = vmov 0.0|0.0   ;;  %vm3280_vm0 = vmmov 0   ;;  %v3281_v1 = vmov 0.0   ;;  %v38_v2 = vld [vmem:[#allocation7] sm:$0xff] }
  0x27   :  { %2916 = vmatprep.subr.bf16.mxu0 %v3279_v0  ;;  %2638 = vmatprep.mubr.msk.f32.mxu0 %vm3280_vm0, %v3281_v1  ;;  %v39_v3 = vld [vmem:[#allocation7 + $0x8] sm:$0xff]  ;;  %v40_v5 = vld [vmem:[#allocation7 + $0x10] sm:$0xff]  ;;  %v41_v6 = vld [vmem:[#allocation7 + $0x18] sm:$0xff]  ;;  %vm59_vm1 = vcmask 130048   ;;  %s3282_s1 = smov 64   ;;  %s3283_s6 = smov 32  }
  0x28   :  { %2919 = vmatprep.subr.bf16.mxu1 %v3279_v0  ;;  %2649 = vmatprep.mubr.msk.f32.mxu1 %vm3280_vm0, %v3281_v1  ;;  %v2917_v4 = vpack.c.bf16 %v39_v3, %v38_v2  ;;  %v54_v7 = vld [vmem:[#allocation4] sm:$0xff]  ;;  %v3337_v8 = vpack.c.bf16 %v41_v6, %v40_v5  ;;  %v42_v9 = vld [vmem:[#allocation7 + $0x20] sm:$0xff]  ;;  %v43_v10 = vld [vmem:[#allocation7 + $0x28] sm:$0xff]  ;;  %vm134_vm2 = vcmask 261120   ;;  %vm410_vm3 = vcmask 253952   ;;  %s3284_s7 = smov [#allocation9]  }
  0x29   :  { %v3341_v11 = vpack.c.bf16 %v43_v10, %v42_v9  ;;  %v2448_v12 = vld [vmem:[#allocation7 + $0x30] ss:$0 sm:$0xff]  ;;  %v49_v31 = vld [vmem:[#allocation7 + $0x58] sm:$0xff]  ;;  %v50_v32 = vld [vmem:[#allocation7 + $0x60] sm:$0xff]  ;;  %s2438_s8 = sshll.u32 %s3284_s7, 4  ;;  %s2439_s8 = int_to_ptr.vmem [resolvable:$true] %s2438_s8 }
  0x2a   :  { %2918 = vmatpush3.bf16.msra.mxu0 %v2917_v4  ;;  %v51_v33 = vld [vmem:[#allocation7 + $0x68] sm:$0xff]  ;;  %v3356_v34 = vpack.c.bf16 %v50_v32, %v49_v31  ;;  %v52_v35 = vld [vmem:[#allocation7 + $0x70] sm:$0xff]  ;;  %v45_v37 = vld [vmem:[#allocation7 + $0x38] sm:$0xff]  ;;  %s3247_s9 = scalar_lea.vmem %s2439_s8, 128  ;;  %p3252_p3 = scmp.lt.s32.totalorder %s2439_s8, %s2439_s8 }
  0x2b   :  { %2925 = vmatprep.subr.bf16.mxu0 %v3279_v0  ;;  %v3359_v36 = vpack.c.bf16 %v52_v35, %v51_v33  ;;  %v46_v38 = vld [vmem:[#allocation7 + $0x40] sm:$0xff]  ;;  %v47_v40 = vld [vmem:[#allocation7 + $0x48] sm:$0xff]  ;;  %v48_v41 = vld [vmem:[#allocation7 + $0x50] sm:$0xff]  ;;  %p3248_p2 = scmp.ne.s32.totalorder %s2439_s8, %s3247_s9  ;;  %p3253_p4 = scmp.lt.s32.totalorder %s3247_s9, %s3247_s9 }
  0x2c   :  { %2921 = vmatpush3.bf16.msra.mxu1 %v3356_v34  ;;  %v3365_v39 = vpack.c.bf16 %v46_v38, %v45_v37  ;;  %v3373_v43 = vpack.c.bf16 %v48_v41, %v47_v40  ;;  %v3395_v47 = vld [vmem:[#allocation7 + $0x78] sm:$0x1] }
  0x2d   :  { %2639 = vmatmul.mubr.msk.f32.vlgmr.msra.gmra.mrb[0].mxu0 %vm59_vm1, %v54_v7  ;;  %2922 = vmatprep.subr.bf16.mxu1 %v3279_v0  ;;  %p3254_p5 = por %p3253_p4, %p3252_p3 }
  0x2e   :  { %2927 = vmatpush3.bf16.msra.mxu0 %v3337_v8  ;;  %2660 = vmatprep.mubr.msk.f32.mxu0 %vm3280_vm0, %v3281_v1 }
  0x2f   :  { %2928 = vmatprep.subr.bf16.mxu0 %v3279_v0  ;;  %p3255_p6 = pnand %p3254_p5, %p3248_p2 }
  0x30   :  { %2924 = vmatpush3.bf16.msra.mxu1 %v3359_v36 }
  0x31   :  { %2931 = vmatprep.subr.bf16.mxu1 %v3279_v0 }
  0x32   :  { %2930 = vmatpush3.bf16.msra.mxu0 %v3341_v11 }
  0x33   :  { %2937 = vmatprep.subr.bf16.mxu0 %v3279_v0  ;;  %2650 = vmatmul.mubr.f32.vlgmr.msra.gmra.mrb[0].mxu1 %v3281_v1 }
  0x34   :  { %2933 = vmatpush3.bf16.msra.mxu1 %v3365_v39  ;;  %2671 = vmatprep.mubr.msk.f32.mxu1 %vm3280_vm0, %v3281_v1 }
  0x35   :  { %2661 = vmatmul.mubr.f32.vlgmr.msra.gmra.mrb[2].mxu0 %v3281_v1  ;;  %2934 = vmatprep.subr.bf16.mxu1 %v3279_v0 }
  0x36   :  { %2682 = vmatprep.mubr.msk.f32.mxu0 %vm3280_vm0, %v3281_v1  ;;  %2939 = vmatpush3.bf16.msra.mxu0 %v3356_v34 }
  0x37   :  { %2940 = vmatprep.subr.bf16.mxu0 %v3279_v0 }
  0x38   :  { %2936 = vmatpush3.bf16.msra.mxu1 %v3373_v43 }
  0x39   :  { %2943 = vmatprep.subr.bf16.mxu1 %v3279_v0 }
  0x3a   :  { %2942 = vmatpush3.bf16.msra.mxu0 %v3359_v36 }
  0x3b   :  { %2949 = vmatprep.subr.bf16.mxu0 %v3279_v0 }
 0x100   :  { %v129_v13 = vpop.f32.mrb[0].mxu0 }
 0x101   :  { %v130_v14 = vadd.f32 %v2448_v12, %v129_v13  ;;  %v2640_v15 = vpop.f32.mrb[1].mxu0 }
 0x103   :  { %133 = vst [vmem:[#allocation2] sm:$0xff] %v130_v14 }
 0x108   :  { %v275_v16 = vpop.f32.mrb[2].mxu0 }
 0x109   :  { %v2662_v17 = vpop.f32.mrb[3].mxu0 }
 0x10a   :  { %v208_v18 = vld [vmem:[#allocation2] sm:$0x1]  ;;  %v484_v52 = vld [vmem:[#allocation2 + $0x1] sm:$0x1] }
 0x10b   :  { %v279_v19 = vadd.f32 %v275_v16, %v208_v18 }
 0x10d   :  { %v2450_v20 = vmul.f32 -1.442695, %v279_v19 }
 0x10f   :  { %3103 = vpow2.f32 %v2450_v20 }
 0x119   :  { %v3104_v21 = vpop.eup %3103 }
 0x11a   :  { %v283_v22 = vadd.f32 1.0, %v3104_v21 }
 0x11c   :  { %3105 = vrcp.f32 %v283_v22 }
 0x126   :  { %v3106_v23 = vpop.eup %3105 }
 0x127   :  { %v286_v24 = vmul.f32 2.0, %v3106_v23  ;;  %v288_v28 = vmul.f32 0.0, %v3106_v23 }
 0x129   :  { %v2451_v25 = vadd.f32 -1.0, %v286_v24 }
 0x12b   :  { %290 = vrot.lane.b32.xlu0 %v2451_v25, %s3282_s1 }
 0x19d   :  { %v291_v26 = vpop.permute.xlu0 %290 }
 0x19e   :  { %v293_v27 = vmul.f32 %v3106_v23, %v291_v26 }
 0x1a0   :  { %295 = vrot.lane.b32.xlu0 %v293_v27, %s3283_s6 }
 0x212   :  { %v296_v29 = vpop.permute.xlu0 %295 }
 0x213   :  { %v3353_v30 = vadd.f32 %v296_v29, %v288_v28  ;;  %v759_v29 = vld [vmem:[#allocation2 + $0x2] sm:$0x1] }
 0x215   :  { %3107 = vtanh.f32 %v3353_v30 }
 0x21f   :  { %v3108_v42 = vpop.eup %3107 }
 0x220   :  { %301 = vrot.lane.b32.xlu1 %v3108_v42, %s3282_s1 }
 0x292   :  { %v302_v44 = vpop.permute.xlu1 %301 }
 0x293   :  { %v304_v45 = vmul.f32 %v3106_v23, %v302_v44 }
 0x295   :  { %306 = vrot.lane.b32.xlu1 %v304_v45, %s3283_s6 }
 0x307   :  { %v307_v46 = vpop.permute.xlu1 %306 }
 0x308   :  { %2672 = vmatmul.mubr.msk.f32.vlgmr.msra.gmra.mrb[0].mxu1 %vm134_vm2, %v307_v46 }
 0x309   :  { %2945 = vmatpush3.bf16.msra.mxu1 %v3337_v8  ;;  %2693 = vmatprep.mubr.msk.f32.mxu1 %vm3280_vm0, %v3281_v1 }
 0x30a   :  { %2946 = vmatprep.subr.bf16.mxu1 %v3279_v0 }
 0x30d   :  { %2948 = vmatpush3.bf16.msra.mxu1 %v3341_v11 }
 0x30e   :  { %2955 = vmatprep.subr.bf16.mxu1 %v3279_v0 }
 0x310   :  { %2694 = vmatmul.mubr.msk.f32.vlgmr.msra.gmra.mrb[2].mxu1 %vm134_vm2, %v307_v46 }
 0x311   :  { %2957 = vmatpush3.bf16.msra.mxu1 %v3356_v34  ;;  %2715 = vmatprep.mubr.msk.f32.mxu1 %vm3280_vm0, %v3281_v1 }
 0x312   :  { %2958 = vmatprep.subr.bf16.mxu1 %v3279_v0 }
 0x315   :  { %2960 = vmatpush3.bf16.msra.mxu1 %v3359_v36 }
 0x316   :  { %2967 = vmatprep.subr.bf16.mxu1 %v3279_v0 }
 0x3db   :  { %v376_v48 = vpop.f32.mrb[0].mxu1 }
 0x3dc   :  { %v3069_v49 = vadd.f32 %v376_v48, %v3395_v47  ;;  %v2673_v50 = vpop.f32.mrb[1].mxu1 }
 0x3de   :  { %v2453_v51 = vmul.f32 -1.442695, %v3069_v49 }
 0x3e0   :  { %3109 = vpow2.f32 %v2453_v51 }
 0x3e3   :  { %v551_v53 = vpop.f32.mrb[2].mxu1 }
 0x3e4   :  { %v555_v54 = vadd.f32 %v551_v53, %v484_v52  ;;  %v2695_v55 = vpop.f32.mrb[3].mxu1 }
 0x3e6   :  { %v2457_v56 = vmul.f32 -1.442695, %v555_v54 }
 0x3e8   :  { %3111 = vpow2.f32 %v2457_v56 }
 0x3ea   :  { %v3110_v57 = vpop.eup %3109 }
 0x3eb   :  { %v384_v58 = vadd.f32 1.0, %v3110_v57 }
 0x3ed   :  { %3113 = vrcp.f32 %v384_v58 }
 0x3f2   :  { %v3112_v59 = vpop.eup %3111 }
 0x3f3   :  { %v559_v60 = vadd.f32 1.0, %v3112_v59 }
 0x3f5   :  { %3115 = vrcp.f32 %v559_v60 }
 0x3f7   :  { %v3114_v61 = vpop.eup %3113 }
 0x3f8   :  { %v387_v62 = vmul.f32 2.0, %v3114_v61  ;;  %v389_v10 = vmul.f32 0.0, %v3114_v61 }
 0x3fa   :  { %v2454_v63 = vadd.f32 -1.0, %v387_v62 }
 0x3fc   :  { %391 = vrot.lane.b32.xlu0 %v2454_v63, %s3282_s1 }
 0x3ff   :  { %v3116_v2 = vpop.eup %3115 }
 0x400   :  { %v562_v3 = vmul.f32 2.0, %v3116_v2  ;;  %v564_v14 = vmul.f32 %v3116_v2, %v3353_v30 }
 0x402   :  { %v2458_v4 = vadd.f32 -1.0, %v562_v3 }
 0x404   :  { %566 = vrot.lane.b32.xlu1 %v2458_v4, %s3282_s1 }
 0x46e   :  { %v392_v5 = vpop.permute.xlu0 %391 }
 0x46f   :  { %v394_v6 = vmul.f32 %v3114_v61, %v392_v5 }
 0x471   :  { %396 = vrot.lane.b32.xlu0 %v394_v6, %s3283_s6 }
 0x476   :  { %v567_v7 = vpop.permute.xlu1 %566 }
 0x477   :  { %v569_v9 = vmul.f32 %v3116_v2, %v567_v7 }
 0x479   :  { %571 = vrot.lane.b32.xlu1 %v569_v9, %s3283_s6 }
 0x4e3   :  { %v397_v12 = vpop.permute.xlu0 %396 }
 0x4e4   :  { %v3402_v13 = vadd.f32 %v397_v12, %v389_v10  ;;  %v1034_v10 = vld [vmem:[#allocation2 + $0x3] sm:$0x1] }
 0x4e6   :  { %3117 = vtanh.f32 %v3402_v13 }
 0x4eb   :  { %v572_v15 = vpop.permute.xlu1 %571 }
 0x4ec   :  { %v3406_v16 = vadd.f32 %v572_v15, %v564_v14 }
 0x4ee   :  { %3119 = vtanh.f32 %v3406_v16 }
 0x4f0   :  { %v3118_v17 = vpop.eup %3117 }
 0x4f1   :  { %402 = vrot.lane.b32.xlu0 %v3118_v17, %s3282_s1 }
 0x4f8   :  { %v3120_v18 = vpop.eup %3119 }
 0x4f9   :  { %577 = vrot.lane.b32.xlu1 %v3120_v18, %s3282_s1 }
 0x563   :  { %v403_v19 = vpop.permute.xlu0 %402 }
 0x564   :  { %v405_v20 = vmul.f32 %v3114_v61, %v403_v19 }
 0x566   :  { %407 = vrot.lane.b32.xlu0 %v405_v20, %s3283_s6 }
 0x56b   :  { %v578_v21 = vpop.permute.xlu1 %577 }
 0x56c   :  { %v580_v22 = vmul.f32 %v3116_v2, %v578_v21 }
 0x56e   :  { %582 = vrot.lane.b32.xlu1 %v580_v22, %s3283_s6 }
 0x5d8   :  { %v408_v23 = vpop.permute.xlu0 %407 }
 0x5d9   :  { %411 = vst.msk [vmem:[#allocation3] sm:$0x1] %vm410_vm3, %v408_v23  ;;  %2683 = vmatmul.mubr.msk.f32.vlgmr.msra.gmra.mrb[4].mxu0 %vm134_vm2, %v408_v23 }
 0x5da   :  { %2951 = vmatpush3.bf16.msra.mxu0 %v3365_v39  ;;  %2704 = vmatprep.mubr.msk.f32.mxu0 %vm3280_vm0, %v3281_v1 }
 0x5db   :  { %2952 = vmatprep.subr.bf16.mxu0 %v3279_v0 }
 0x5de   :  { %2954 = vmatpush3.bf16.msra.mxu0 %v3373_v43 }
 0x5df   :  { %2961 = vmatprep.subr.bf16.mxu0 %v3279_v0 }
 0x5e0   :  { %v583_v24 = vpop.permute.xlu1 %582 }
 0x5e1   :  { %2705 = vmatmul.mubr.msk.f32.vlgmr.msra.gmra.mrb[4].mxu0 %vm134_vm2, %v583_v24 }
 0x5e2   :  { %2963 = vmatpush3.bf16.msra.mxu0 %v3337_v8  ;;  %2726 = vmatprep.mubr.msk.f32.mxu0 %vm3280_vm0, %v3281_v1 }
 0x5e3   :  { %2964 = vmatprep.subr.bf16.mxu0 %v3279_v0 }
 0x5e6   :  { %2966 = vmatpush3.bf16.msra.mxu0 %v3341_v11 }
 0x5e7   :  { %2973 = vmatprep.subr.bf16.mxu0 %v3279_v0 }
 0x5e9   :  { %2727 = vmatmul.mubr.msk.f32.vlgmr.msra.gmra.mrb[6].mxu0 %vm134_vm2, %v583_v24 }
 0x5ea   :  { %2975 = vmatpush3.bf16.msra.mxu0 %v3356_v34  ;;  %2748 = vmatprep.mubr.msk.f32.mxu0 %vm3280_vm0, %v3281_v1 }
 0x5eb   :  { %2976 = vmatprep.subr.bf16.mxu0 %v3279_v0 }
 0x5ee   :  { %2978 = vmatpush3.bf16.msra.mxu0 %v3359_v36 }
 0x5ef   :  { %2985 = vmatprep.subr.bf16.mxu0 %v3279_v0 }
 0x6b4   :  { %v652_v25 = vpop.f32.mrb[4].mxu0 }
 0x6b5   :  { %v3070_v26 = vadd.f32 %v652_v25, %v3395_v47  ;;  %v2706_v27 = vpop.f32.mrb[5].mxu0 }
 0x6b7   :  { %v2460_v28 = vmul.f32 -1.442695, %v3070_v26 }
 0x6b9   :  { %3121 = vpow2.f32 %v2460_v28 }
 0x6bc   :  { %v826_v30 = vpop.f32.mrb[6].mxu0 }
 0x6bd   :  { %v830_v31 = vadd.f32 %v826_v30, %v759_v29  ;;  %v2728_v32 = vpop.f32.mrb[7].mxu0 }
 0x6bf   :  { %v2464_v33 = vmul.f32 -1.442695, %v830_v31 }
 0x6c1   :  { %3123 = vpow2.f32 %v2464_v33 }
 0x6c3   :  { %v3122_v35 = vpop.eup %3121 }
 0x6c4   :  { %v660_v37 = vadd.f32 1.0, %v3122_v35 }
 0x6c6   :  { %3125 = vrcp.f32 %v660_v37 }
 0x6cb   :  { %v3124_v38 = vpop.eup %3123 }
 0x6cc   :  { %v834_v40 = vadd.f32 1.0, %v3124_v38 }
 0x6ce   :  { %3127 = vrcp.f32 %v834_v40 }
 0x6d0   :  { %v3126_v41 = vpop.eup %3125 }
 0x6d1   :  { %v663_v42 = vmul.f32 2.0, %v3126_v41  ;;  %v665_v53 = vmul.f32 %v3126_v41, %v3402_v13 }
 0x6d3   :  { %v2461_v44 = vadd.f32 -1.0, %v663_v42 }
 0x6d5   :  { %667 = vrot.lane.b32.xlu0 %v2461_v44, %s3282_s1 }
 0x6d8   :  { %v3128_v45 = vpop.eup %3127 }
 0x6d9   :  { %v837_v46 = vmul.f32 2.0, %v3128_v45  ;;  %v839_v56 = vmul.f32 %v3128_v45, %v3406_v16 }
 0x6db   :  { %v2465_v48 = vadd.f32 -1.0, %v837_v46 }
 0x6dd   :  { %841 = vrot.lane.b32.xlu1 %v2465_v48, %s3282_s1 }
 0x747   :  { %v668_v49 = vpop.permute.xlu0 %667 }
 0x748   :  { %v670_v50 = vmul.f32 %v3126_v41, %v668_v49 }
 0x74a   :  { %672 = vrot.lane.b32.xlu0 %v670_v50, %s3283_s6 }
 0x74f   :  { %v842_v51 = vpop.permute.xlu1 %841 }
 0x750   :  { %v844_v52 = vmul.f32 %v3128_v45, %v842_v51 }
 0x752   :  { %846 = vrot.lane.b32.xlu1 %v844_v52, %s3283_s6 }
 0x7bc   :  { %v673_v54 = vpop.permute.xlu0 %672 }
 0x7bd   :  { %v3441_v55 = vadd.f32 %v673_v54, %v665_v53  ;;  %v1309_v53 = vld [vmem:[#allocation2 + $0x4] sm:$0x1] }
 0x7bf   :  { %3129 = vtanh.f32 %v3441_v55 }
 0x7c4   :  { %v847_v57 = vpop.permute.xlu1 %846 }
 0x7c5   :  { %v3445_v58 = vadd.f32 %v847_v57, %v839_v56 }
 0x7c7   :  { %3131 = vtanh.f32 %v3445_v58 }
 0x7c9   :  { %v3130_v59 = vpop.eup %3129 }
 0x7ca   :  { %678 = vrot.lane.b32.xlu0 %v3130_v59, %s3282_s1 }
 0x7d1   :  { %v3132_v60 = vpop.eup %3131 }
 0x7d2   :  { %852 = vrot.lane.b32.xlu1 %v3132_v60, %s3282_s1 }
 0x83c   :  { %v679_v61 = vpop.permute.xlu0 %678 }
 0x83d   :  { %v681_v62 = vmul.f32 %v3126_v41, %v679_v61 }
 0x83f   :  { %683 = vrot.lane.b32.xlu0 %v681_v62, %s3283_s6 }
 0x844   :  { %v853_v63 = vpop.permute.xlu1 %852 }
 0x845   :  { %v855_v2 = vmul.f32 %v3128_v45, %v853_v63 }
 0x847   :  { %857 = vrot.lane.b32.xlu1 %v855_v2, %s3283_s6 }
 0x8b1   :  { %v684_v3 = vpop.permute.xlu0 %683 }
 0x8b2   :  { %686 = vst.msk [vmem:[#allocation3 + $0x1] sm:$0x1] %vm410_vm3, %v684_v3  ;;  %2716 = vmatmul.mubr.msk.f32.vlgmr.msra.gmra.mrb[4].mxu1 %vm134_vm2, %v684_v3 }
 0x8b3   :  { %2969 = vmatpush3.bf16.msra.mxu1 %v3365_v39  ;;  %2737 = vmatprep.mubr.msk.f32.mxu1 %vm3280_vm0, %v3281_v1 }
 0x8b4   :  { %2970 = vmatprep.subr.bf16.mxu1 %v3279_v0 }
 0x8b7   :  { %2972 = vmatpush3.bf16.msra.mxu1 %v3373_v43 }
 0x8b8   :  { %2979 = vmatprep.subr.bf16.mxu1 %v3279_v0 }
 0x8b9   :  { %v858_v4 = vpop.permute.xlu1 %857 }
 0x8ba   :  { %2738 = vmatmul.mubr.msk.f32.vlgmr.msra.gmra.mrb[4].mxu1 %vm134_vm2, %v858_v4 }
 0x8bb   :  { %2981 = vmatpush3.bf16.msra.mxu1 %v3337_v8  ;;  %2759 = vmatprep.mubr.msk.f32.mxu1 %vm3280_vm0, %v3281_v1 }
 0x8bc   :  { %2982 = vmatprep.subr.bf16.mxu1 %v3279_v0 }
 0x8bf   :  { %2984 = vmatpush3.bf16.msra.mxu1 %v3341_v11 }
 0x8c0   :  { %2991 = vmatprep.subr.bf16.mxu1 %v3279_v0 }
 0x8c2   :  { %2760 = vmatmul.mubr.msk.f32.vlgmr.msra.gmra.mrb[6].mxu1 %vm134_vm2, %v858_v4 }
 0x8c3   :  { %2993 = vmatpush3.bf16.msra.mxu1 %v3356_v34  ;;  %2781 = vmatprep.mubr.msk.f32.mxu1 %vm3280_vm0, %v3281_v1 }
 0x8c4   :  { %2994 = vmatprep.subr.bf16.mxu1 %v3279_v0 }
 0x8c7   :  { %2996 = vmatpush3.bf16.msra.mxu1 %v3359_v36 }
 0x8c8   :  { %3003 = vmatprep.subr.bf16.mxu1 %v3279_v0 }
 0x98d   :  { %v927_v5 = vpop.f32.mrb[4].mxu1 }
 0x98e   :  { %v3071_v6 = vadd.f32 %v927_v5, %v3395_v47  ;;  %v2739_v7 = vpop.f32.mrb[5].mxu1 }
 0x990   :  { %v2467_v9 = vmul.f32 -1.442695, %v3071_v6 }
 0x992   :  { %3133 = vpow2.f32 %v2467_v9 }
 0x995   :  { %v1101_v12 = vpop.f32.mrb[6].mxu1 }
 0x996   :  { %v1105_v13 = vadd.f32 %v1101_v12, %v1034_v10  ;;  %v2761_v14 = vpop.f32.mrb[7].mxu1 }
 0x998   :  { %v2471_v15 = vmul.f32 -1.442695, %v1105_v13 }
 0x99a   :  { %3135 = vpow2.f32 %v2471_v15 }
 0x99c   :  { %v3134_v16 = vpop.eup %3133 }
 0x99d   :  { %v935_v17 = vadd.f32 1.0, %v3134_v16 }
 0x99f   :  { %3137 = vrcp.f32 %v935_v17 }
 0x9a4   :  { %v3136_v18 = vpop.eup %3135 }
 0x9a5   :  { %v1109_v19 = vadd.f32 1.0, %v3136_v18 }
 0x9a7   :  { %3139 = vrcp.f32 %v1109_v19 }
 0x9a9   :  { %v3138_v20 = vpop.eup %3137 }
 0x9aa   :  { %v938_v21 = vmul.f32 2.0, %v3138_v20  ;;  %v940_v30 = vmul.f32 %v3138_v20, %v3441_v55 }
 0x9ac   :  { %v2468_v22 = vadd.f32 -1.0, %v938_v21 }
 0x9ae   :  { %942 = vrot.lane.b32.xlu0 %v2468_v22, %s3282_s1 }
 0x9b1   :  { %v3140_v23 = vpop.eup %3139 }
 0x9b2   :  { %v1112_v24 = vmul.f32 2.0, %v3140_v23  ;;  %v1114_v33 = vmul.f32 %v3140_v23, %v3445_v58 }
 0x9b4   :  { %v2472_v25 = vadd.f32 -1.0, %v1112_v24 }
 0x9b6   :  { %1116 = vrot.lane.b32.xlu1 %v2472_v25, %s3282_s1 }
 0xa20   :  { %v943_v26 = vpop.permute.xlu0 %942 }
 0xa21   :  { %v945_v27 = vmul.f32 %v3138_v20, %v943_v26 }
 0xa23   :  { %947 = vrot.lane.b32.xlu0 %v945_v27, %s3283_s6 }
 0xa28   :  { %v1117_v28 = vpop.permute.xlu1 %1116 }
 0xa29   :  { %v1119_v29 = vmul.f32 %v3140_v23, %v1117_v28 }
 0xa2b   :  { %1121 = vrot.lane.b32.xlu1 %v1119_v29, %s3283_s6 }
 0xa95   :  { %v948_v31 = vpop.permute.xlu0 %947 }
 0xa96   :  { %v3480_v32 = vadd.f32 %v948_v31, %v940_v30  ;;  %v1584_v30 = vld [vmem:[#allocation2 + $0x5] sm:$0x1] }
 0xa98   :  { %3141 = vtanh.f32 %v3480_v32 }
 0xa9d   :  { %v1122_v35 = vpop.permute.xlu1 %1121 }
 0xa9e   :  { %v3484_v37 = vadd.f32 %v1122_v35, %v1114_v33 }
 0xaa0   :  { %3143 = vtanh.f32 %v3484_v37 }
 0xaa2   :  { %v3142_v38 = vpop.eup %3141 }
 0xaa3   :  { %953 = vrot.lane.b32.xlu0 %v3142_v38, %s3282_s1 }
 0xaaa   :  { %v3144_v40 = vpop.eup %3143 }
 0xaab   :  { %1127 = vrot.lane.b32.xlu1 %v3144_v40, %s3282_s1 }
 0xb15   :  { %v954_v41 = vpop.permute.xlu0 %953 }
 0xb16   :  { %v956_v42 = vmul.f32 %v3138_v20, %v954_v41 }
 0xb18   :  { %958 = vrot.lane.b32.xlu0 %v956_v42, %s3283_s6 }
 0xb1d   :  { %v1128_v44 = vpop.permute.xlu1 %1127 }
 0xb1e   :  { %v1130_v45 = vmul.f32 %v3140_v23, %v1128_v44 }
 0xb20   :  { %1132 = vrot.lane.b32.xlu1 %v1130_v45, %s3283_s6 }
 0xb8a   :  { %v959_v46 = vpop.permute.xlu0 %958 }
 0xb8b   :  { %961 = vst.msk [vmem:[#allocation3 + $0x2] sm:$0x1] %vm410_vm3, %v959_v46  ;;  %2749 = vmatmul.mubr.msk.f32.vlgmr.msra.gmra.mrb[8].mxu0 %vm134_vm2, %v959_v46 }
 0xb8c   :  { %2987 = vmatpush3.bf16.msra.mxu0 %v3365_v39  ;;  %2770 = vmatprep.mubr.msk.f32.mxu0 %vm3280_vm0, %v3281_v1 }
 0xb8d   :  { %2988 = vmatprep.subr.bf16.mxu0 %v3279_v0 }
 0xb90   :  { %2990 = vmatpush3.bf16.msra.mxu0 %v3373_v43 }
 0xb91   :  { %2997 = vmatprep.subr.bf16.mxu0 %v3279_v0 }
 0xb92   :  { %v1133_v48 = vpop.permute.xlu1 %1132 }
 0xb93   :  { %2771 = vmatmul.mubr.msk.f32.vlgmr.msra.gmra.mrb[8].mxu0 %vm134_vm2, %v1133_v48 }
 0xb94   :  { %2999 = vmatpush3.bf16.msra.mxu0 %v3337_v8  ;;  %2792 = vmatprep.mubr.msk.f32.mxu0 %vm3280_vm0, %v3281_v1 }
 0xb95   :  { %3000 = vmatprep.subr.bf16.mxu0 %v3279_v0 }
 0xb98   :  { %3002 = vmatpush3.bf16.msra.mxu0 %v3341_v11 }
 0xb99   :  { %3009 = vmatprep.subr.bf16.mxu0 %v3279_v0 }
 0xb9b   :  { %2793 = vmatmul.mubr.msk.f32.vlgmr.msra.gmra.mrb[10].mxu0 %vm134_vm2, %v1133_v48 }
 0xb9c   :  { %3011 = vmatpush3.bf16.msra.mxu0 %v3356_v34  ;;  %2814 = vmatprep.mubr.msk.f32.mxu0 %vm3280_vm0, %v3281_v1 }
 0xb9d   :  { %3012 = vmatprep.subr.bf16.mxu0 %v3279_v0 }
 0xba0   :  { %3014 = vmatpush3.bf16.msra.mxu0 %v3359_v36 }
 0xba1   :  { %3021 = vmatprep.subr.bf16.mxu0 %v3279_v0 }
 0xc66   :  { %v1202_v49 = vpop.f32.mrb[8].mxu0 }
 0xc67   :  { %v3072_v50 = vadd.f32 %v1202_v49, %v3395_v47  ;;  %v2772_v51 = vpop.f32.mrb[9].mxu0 }
 0xc69   :  { %v2474_v52 = vmul.f32 -1.442695, %v3072_v50 }
 0xc6b   :  { %3145 = vpow2.f32 %v2474_v52 }
 0xc6e   :  { %v1376_v54 = vpop.f32.mrb[10].mxu0 }
 0xc6f   :  { %v1380_v55 = vadd.f32 %v1376_v54, %v1309_v53  ;;  %v2794_v56 = vpop.f32.mrb[11].mxu0 }
 0xc71   :  { %v2478_v57 = vmul.f32 -1.442695, %v1380_v55 }
 0xc73   :  { %3147 = vpow2.f32 %v2478_v57 }
 0xc75   :  { %v3146_v58 = vpop.eup %3145 }
 0xc76   :  { %v1210_v59 = vadd.f32 1.0, %v3146_v58 }
 0xc78   :  { %3149 = vrcp.f32 %v1210_v59 }
 0xc7d   :  { %v3148_v60 = vpop.eup %3147 }
 0xc7e   :  { %v1384_v61 = vadd.f32 1.0, %v3148_v60 }
 0xc80   :  { %3151 = vrcp.f32 %v1384_v61 }
 0xc82   :  { %v3150_v62 = vpop.eup %3149 }
 0xc83   :  { %v1213_v63 = vmul.f32 2.0, %v3150_v62  ;;  %v1215_v12 = vmul.f32 %v3150_v62, %v3480_v32 }
 0xc85   :  { %v2475_v2 = vadd.f32 -1.0, %v1213_v63 }
 0xc87   :  { %1217 = vrot.lane.b32.xlu0 %v2475_v2, %s3282_s1 }
 0xc8a   :  { %v3152_v3 = vpop.eup %3151 }
 0xc8b   :  { %v1387_v4 = vmul.f32 2.0, %v3152_v3  ;;  %v1389_v15 = vmul.f32 %v3152_v3, %v3484_v37 }
 0xc8d   :  { %v2479_v5 = vadd.f32 -1.0, %v1387_v4 }
 0xc8f   :  { %1391 = vrot.lane.b32.xlu1 %v2479_v5, %s3282_s1 }
 0xcf9   :  { %v1218_v6 = vpop.permute.xlu0 %1217 }
 0xcfa   :  { %v1220_v7 = vmul.f32 %v3150_v62, %v1218_v6 }
 0xcfc   :  { %1222 = vrot.lane.b32.xlu0 %v1220_v7, %s3283_s6 }
 0xd01   :  { %v1392_v9 = vpop.permute.xlu1 %1391 }
 0xd02   :  { %v1394_v10 = vmul.f32 %v3152_v3, %v1392_v9 }
 0xd04   :  { %1396 = vrot.lane.b32.xlu1 %v1394_v10, %s3283_s6 }
 0xd6e   :  { %v1223_v13 = vpop.permute.xlu0 %1222 }
 0xd6f   :  { %v3519_v14 = vadd.f32 %v1223_v13, %v1215_v12  ;;  %v1859_v12 = vld [vmem:[#allocation2 + $0x6] sm:$0x1] }
 0xd71   :  { %3153 = vtanh.f32 %v3519_v14 }
 0xd76   :  { %v1397_v16 = vpop.permute.xlu1 %1396 }
 0xd77   :  { %v3523_v17 = vadd.f32 %v1397_v16, %v1389_v15 }
 0xd79   :  { %3155 = vtanh.f32 %v3523_v17 }
 0xd7b   :  { %v3154_v18 = vpop.eup %3153 }
 0xd7c   :  { %1228 = vrot.lane.b32.xlu0 %v3154_v18, %s3282_s1 }
 0xd83   :  { %v3156_v19 = vpop.eup %3155 }
 0xd84   :  { %1402 = vrot.lane.b32.xlu1 %v3156_v19, %s3282_s1 }
 0xdee   :  { %v1229_v20 = vpop.permute.xlu0 %1228 }
 0xdef   :  { %v1231_v21 = vmul.f32 %v3150_v62, %v1229_v20 }
 0xdf1   :  { %1233 = vrot.lane.b32.xlu0 %v1231_v21, %s3283_s6 }
 0xdf6   :  { %v1403_v22 = vpop.permute.xlu1 %1402 }
 0xdf7   :  { %v1405_v23 = vmul.f32 %v3152_v3, %v1403_v22 }
 0xdf9   :  { %1407 = vrot.lane.b32.xlu1 %v1405_v23, %s3283_s6 }
 0xe63   :  { %v1234_v24 = vpop.permute.xlu0 %1233 }
 0xe64   :  { %1236 = vst.msk [vmem:[#allocation3 + $0x3] sm:$0x1] %vm410_vm3, %v1234_v24  ;;  %2782 = vmatmul.mubr.msk.f32.vlgmr.msra.gmra.mrb[8].mxu1 %vm134_vm2, %v1234_v24 }
 0xe65   :  { %3005 = vmatpush3.bf16.msra.mxu1 %v3365_v39  ;;  %2803 = vmatprep.mubr.msk.f32.mxu1 %vm3280_vm0, %v3281_v1 }
 0xe66   :  { %3006 = vmatprep.subr.bf16.mxu1 %v3279_v0 }
 0xe69   :  { %3008 = vmatpush3.bf16.msra.mxu1 %v3373_v43 }
 0xe6a   :  { %3015 = vmatprep.subr.bf16.mxu1 %v3279_v0 }
 0xe6b   :  { %v1408_v25 = vpop.permute.xlu1 %1407 }
 0xe6c   :  { %2804 = vmatmul.mubr.msk.f32.vlgmr.msra.gmra.mrb[8].mxu1 %vm134_vm2, %v1408_v25 }
 0xe6d   :  { %3017 = vmatpush3.bf16.msra.mxu1 %v3337_v8  ;;  %2825 = vmatprep.mubr.msk.f32.mxu1 %vm3280_vm0, %v3281_v1 }
 0xe6e   :  { %3018 = vmatprep.subr.bf16.mxu1 %v3279_v0 }
 0xe71   :  { %3020 = vmatpush3.bf16.msra.mxu1 %v3341_v11 }
 0xe72   :  { %3027 = vmatprep.subr.bf16.mxu1 %v3279_v0 }
 0xe74   :  { %2826 = vmatmul.mubr.msk.f32.vlgmr.msra.gmra.mrb[10].mxu1 %vm134_vm2, %v1408_v25 }
 0xe75   :  { %3029 = vmatpush3.bf16.msra.mxu1 %v3356_v34  ;;  %2847 = vmatprep.mubr.msk.f32.mxu1 %vm3280_vm0, %v3281_v1 }
 0xe76   :  { %3030 = vmatprep.subr.bf16.mxu1 %v3279_v0 }
 0xe79   :  { %3032 = vmatpush3.bf16.msra.mxu1 %v3359_v36 }
 0xe7a   :  { %3039 = vmatprep.subr.bf16.mxu1 %v3279_v0 }
 0xf3f   :  { %v1477_v26 = vpop.f32.mrb[8].mxu1 }
 0xf40   :  { %v3073_v27 = vadd.f32 %v1477_v26, %v3395_v47  ;;  %v2805_v28 = vpop.f32.mrb[9].mxu1 }
 0xf42   :  { %v2481_v29 = vmul.f32 -1.442695, %v3073_v27 }
 0xf44   :  { %3157 = vpow2.f32 %v2481_v29 }
 0xf47   :  { %v1651_v31 = vpop.f32.mrb[10].mxu1 }
 0xf48   :  { %v1655_v32 = vadd.f32 %v1651_v31, %v1584_v30  ;;  %v2827_v33 = vpop.f32.mrb[11].mxu1 }
 0xf4a   :  { %v2485_v35 = vmul.f32 -1.442695, %v1655_v32 }
 0xf4c   :  { %3159 = vpow2.f32 %v2485_v35 }
 0xf4e   :  { %v3158_v37 = vpop.eup %3157 }
 0xf4f   :  { %v1485_v38 = vadd.f32 1.0, %v3158_v37 }
 0xf51   :  { %3161 = vrcp.f32 %v1485_v38 }
 0xf56   :  { %v3160_v40 = vpop.eup %3159 }
 0xf57   :  { %v1659_v41 = vadd.f32 1.0, %v3160_v40 }
 0xf59   :  { %3163 = vrcp.f32 %v1659_v41 }
 0xf5b   :  { %v3162_v42 = vpop.eup %3161 }
 0xf5c   :  { %v1488_v44 = vmul.f32 2.0, %v3162_v42  ;;  %v1490_v54 = vmul.f32 %v3162_v42, %v3519_v14 }
 0xf5e   :  { %v2482_v45 = vadd.f32 -1.0, %v1488_v44 }
 0xf60   :  { %1492 = vrot.lane.b32.xlu0 %v2482_v45, %s3282_s1 }
 0xf63   :  { %v3164_v46 = vpop.eup %3163 }
 0xf64   :  { %v1662_v48 = vmul.f32 2.0, %v3164_v46  ;;  %v1664_v57 = vmul.f32 %v3164_v46, %v3523_v17 }
 0xf66   :  { %v2486_v49 = vadd.f32 -1.0, %v1662_v48 }
 0xf68   :  { %1666 = vrot.lane.b32.xlu1 %v2486_v49, %s3282_s1 }
 0xfd2   :  { %v1493_v50 = vpop.permute.xlu0 %1492 }
 0xfd3   :  { %v1495_v51 = vmul.f32 %v3162_v42, %v1493_v50 }
 0xfd5   :  { %1497 = vrot.lane.b32.xlu0 %v1495_v51, %s3283_s6 }
 0xfda   :  { %v1667_v52 = vpop.permute.xlu1 %1666 }
 0xfdb   :  { %v1669_v53 = vmul.f32 %v3164_v46, %v1667_v52 }
 0xfdd   :  { %1671 = vrot.lane.b32.xlu1 %v1669_v53, %s3283_s6 }
0x1047   :  { %v1498_v55 = vpop.permute.xlu0 %1497 }
0x1048   :  { %v3558_v56 = vadd.f32 %v1498_v55, %v1490_v54 }
0x104a   :  { %3165 = vtanh.f32 %v3558_v56 }
0x104f   :  { %v1672_v58 = vpop.permute.xlu1 %1671 }
0x1050   :  { %v3562_v59 = vadd.f32 %v1672_v58, %v1664_v57 }
0x1052   :  { %3167 = vtanh.f32 %v3562_v59 }
0x1054   :  { %v3166_v60 = vpop.eup %3165 }
0x1055   :  { %1503 = vrot.lane.b32.xlu0 %v3166_v60, %s3282_s1 }
0x105c   :  { %v3168_v61 = vpop.eup %3167 }
0x105d   :  { %1677 = vrot.lane.b32.xlu1 %v3168_v61, %s3282_s1 }
0x10c7   :  { %v1504_v62 = vpop.permute.xlu0 %1503 }
0x10c8   :  { %v1506_v63 = vmul.f32 %v3162_v42, %v1504_v62 }
0x10ca   :  { %1508 = vrot.lane.b32.xlu0 %v1506_v63, %s3283_s6 }
0x10cf   :  { %v1678_v2 = vpop.permute.xlu1 %1677 }
0x10d0   :  { %v1680_v3 = vmul.f32 %v3164_v46, %v1678_v2 }
0x10d2   :  { %1682 = vrot.lane.b32.xlu1 %v1680_v3, %s3283_s6 }
0x113c   :  { %v1509_v4 = vpop.permute.xlu0 %1508 }
0x113d   :  { %1511 = vst.msk [vmem:[#allocation3 + $0x4] sm:$0x1] %vm410_vm3, %v1509_v4  ;;  %2815 = vmatmul.mubr.msk.f32.vlgmr.msra.gmra.mrb[12].mxu0 %vm134_vm2, %v1509_v4 }
0x113e   :  { %3023 = vmatpush3.bf16.msra.mxu0 %v3365_v39  ;;  %2836 = vmatprep.mubr.msk.f32.mxu0 %vm3280_vm0, %v3281_v1 }
0x113f   :  { %3024 = vmatprep.subr.bf16.mxu0 %v3279_v0 }
0x1142   :  { %3026 = vmatpush3.bf16.msra.mxu0 %v3373_v43 }
0x1143   :  { %3033 = vmatprep.subr.bf16.mxu0 %v3279_v0 }
0x1144   :  { %v1683_v5 = vpop.permute.xlu1 %1682 }
0x1145   :  { %2837 = vmatmul.mubr.msk.f32.vlgmr.msra.gmra.mrb[12].mxu0 %vm134_vm2, %v1683_v5 }
0x1146   :  { %3035 = vmatpush3.bf16.msra.mxu0 %v3337_v8  ;;  %2858 = vmatprep.mubr.msk.f32.mxu0 %vm3280_vm0, %v3281_v1 }
0x1147   :  { %3036 = vmatprep.subr.bf16.mxu0 %v3279_v0 }
0x114a   :  { %3038 = vmatpush3.bf16.msra.mxu0 %v3341_v11 }
0x114b   :  { %3045 = vmatprep.subr.bf16.mxu0 %v3279_v0 }
0x114d   :  { %2859 = vmatmul.mubr.msk.f32.vlgmr.msra.gmra.mrb[14].mxu0 %vm134_vm2, %v1683_v5 }
0x114e   :  { %3047 = vmatpush3.bf16.msra.mxu0 %v3356_v34  ;;  %2880 = vmatprep.mubr.msk.f32.mxu0 %vm3280_vm0, %v3281_v1 }
0x114f   :  { %3048 = vmatprep.subr.bf16.mxu0 %v3279_v0 }
0x1152   :  { %3050 = vmatpush3.bf16.msra.mxu0 %v3359_v36 }
0x1153   :  { %3057 = vmatprep.subr.bf16.mxu0 %v3279_v0 }
0x1218   :  { %v1752_v6 = vpop.f32.mrb[12].mxu0 }
0x1219   :  { %v3074_v7 = vadd.f32 %v1752_v6, %v3395_v47  ;;  %v2838_v9 = vpop.f32.mrb[13].mxu0 }
0x121b   :  { %v2488_v10 = vmul.f32 -1.442695, %v3074_v7 }
0x121d   :  { %3169 = vpow2.f32 %v2488_v10 }
0x1220   :  { %v1926_v13 = vpop.f32.mrb[14].mxu0 }
0x1221   :  { %v1930_v14 = vadd.f32 %v1926_v13, %v1859_v12  ;;  %v2860_v15 = vpop.f32.mrb[15].mxu0 }
0x1223   :  { %v2492_v34 = vmul.f32 -1.442695, %v1930_v14 }
0x1225   :  { %3171 = vpow2.f32 %v2492_v34 }
0x1227   :  { %v3170_v16 = vpop.eup %3169 }
0x1228   :  { %v1760_v17 = vadd.f32 1.0, %v3170_v16 }
0x122a   :  { %3173 = vrcp.f32 %v1760_v17 }
0x122f   :  { %v3172_v18 = vpop.eup %3171 }
0x1230   :  { %v1934_v19 = vadd.f32 1.0, %v3172_v18 }
0x1232   :  { %3175 = vrcp.f32 %v1934_v19 }
0x1234   :  { %v3174_v36 = vpop.eup %3173 }
0x1235   :  { %v1763_v20 = vmul.f32 2.0, %v3174_v36  ;;  %v1765_v29 = vmul.f32 %v3174_v36, %v3558_v56 }
0x1237   :  { %v2489_v21 = vadd.f32 -1.0, %v1763_v20 }
0x1239   :  { %1767 = vrot.lane.b32.xlu0 %v2489_v21, %s3282_s1 }
0x123c   :  { %v3176_v22 = vpop.eup %3175 }
0x123d   :  { %v1937_v23 = vmul.f32 2.0, %v3176_v22  ;;  %v1939_v32 = vmul.f32 %v3176_v22, %v3562_v59 }
0x123f   :  { %v2493_v24 = vadd.f32 -1.0, %v1937_v23 }
0x1241   :  { %1941 = vrot.lane.b32.xlu1 %v2493_v24, %s3282_s1 }
0x12ab   :  { %v1768_v25 = vpop.permute.xlu0 %1767 }
0x12ac   :  { %v1770_v26 = vmul.f32 %v3174_v36, %v1768_v25 }
0x12ae   :  { %1772 = vrot.lane.b32.xlu0 %v1770_v26, %s3283_s6 }
0x12b3   :  { %v1942_v27 = vpop.permute.xlu1 %1941 }
0x12b4   :  { %v1944_v28 = vmul.f32 %v3176_v22, %v1942_v27 }
0x12b6   :  { %1946 = vrot.lane.b32.xlu1 %v1944_v28, %s3283_s6 }
0x1320   :  { %v1773_v30 = vpop.permute.xlu0 %1772 }
0x1321   :  { %v3597_v31 = vadd.f32 %v1773_v30, %v1765_v29 }
0x1323   :  { %3177 = vtanh.f32 %v3597_v31 }
0x1328   :  { %v1947_v33 = vpop.permute.xlu1 %1946 }
0x1329   :  { %v3601_v35 = vadd.f32 %v1947_v33, %v1939_v32  ;;  %v2337_v32 = vld [vmem:[#allocation7 + $0x80] sm:$0xff]  ;;  %v2338_v33 = vld [vmem:[#allocation7 + $0x88] sm:$0xff] }
0x132b   :  { %3179 = vtanh.f32 %v3601_v35 }
0x132d   :  { %v3178_v37 = vpop.eup %3177 }
0x132e   :  { %1778 = vrot.lane.b32.xlu0 %v3178_v37, %s3282_s1  ;;  %v3064_v37 = vpack.c.bf16 %v2338_v33, %v2337_v32 }
0x1335   :  { %v3180_v38 = vpop.eup %3179 }
0x1336   :  { %1952 = vrot.lane.b32.xlu1 %v3180_v38, %s3282_s1  ;;  %v2340_v38 = vld [vmem:[#allocation7 + $0x98] sm:$0xff] }
0x13a0   :  { %v1779_v40 = vpop.permute.xlu0 %1778 }
0x13a1   :  { %v1781_v41 = vmul.f32 %v3174_v36, %v1779_v40 }
0x13a3   :  { %1783 = vrot.lane.b32.xlu0 %v1781_v41, %s3283_s6 }
0x13a8   :  { %v1953_v42 = vpop.permute.xlu1 %1952 }
0x13a9   :  { %v1955_v44 = vmul.f32 %v3176_v22, %v1953_v42 }
0x13ab   :  { %1957 = vrot.lane.b32.xlu1 %v1955_v44, %s3283_s6 }
0x1415   :  { %v1784_v45 = vpop.permute.xlu0 %1783 }
0x1416   :  { %1786 = vst.msk [vmem:[#allocation3 + $0x5] sm:$0x1] %vm410_vm3, %v1784_v45  ;;  %2848 = vmatmul.mubr.msk.f32.vlgmr.msra.gmra.mrb[12].mxu1 %vm134_vm2, %v1784_v45 }
0x1417   :  { %3041 = vmatpush3.bf16.msra.mxu1 %v3365_v39  ;;  %2869 = vmatprep.mubr.msk.f32.mxu1 %vm3280_vm0, %v3281_v1 }
0x1418   :  { %3042 = vmatprep.subr.bf16.mxu1 %v3279_v0 }
0x141b   :  { %3044 = vmatpush3.bf16.msra.mxu1 %v3373_v43 }
0x141c   :  { %3051 = vmatprep.subr.bf16.mxu1 %v3279_v0 }
0x141d   :  { %v1958_v46 = vpop.permute.xlu1 %1957 }
0x141e   :  { %2870 = vmatmul.mubr.msk.f32.vlgmr.msra.gmra.mrb[12].mxu1 %vm134_vm2, %v1958_v46 }
0x141f   :  { %3053 = vmatpush3.bf16.msra.mxu1 %v3337_v8  ;;  %2891 = vmatprep.mubr.msk.f32.mxu1 %vm3280_vm0, %v3281_v1  ;;  %v2134_v8 = vld [vmem:[#allocation2 + $0x7] sm:$0x1] }
0x1420   :  { %3054 = vmatprep.subr.bf16.mxu1 %v3279_v0 }
0x1423   :  { %3056 = vmatpush3.bf16.msra.mxu1 %v3341_v11 }
0x1424   :  { %3063 = vmatprep.subr.bf16.mxu1 %v3279_v0 }
0x1426   :  { %2892 = vmatmul.mubr.msk.f32.vlgmr.msra.gmra.mrb[14].mxu1 %vm134_vm2, %v1958_v46  ;;  %v2504_v46 = vld [vmem:[#allocation7 + $0xa0] ss:$0 sm:$0xff] }
0x1427   :  { %2913 = vmatprep.mubr.msk.f32.mxu1 %vm3280_vm0, %v3281_v1  ;;  %3065 = vmatpush3.bf16.msra.mxu1 %v3064_v37 }
0x1428   :  { %3066 = vmatprep.subr.bf16.mxu1 %v3279_v0 }
0x14f1   :  { %v2027_v48 = vpop.f32.mrb[12].mxu1 }
0x14f2   :  { %v3075_v49 = vadd.f32 %v2027_v48, %v3395_v47  ;;  %v2871_v50 = vpop.f32.mrb[13].mxu1 }
0x14f4   :  { %v2495_v51 = vmul.f32 -1.442695, %v3075_v49 }
0x14f6   :  { %3181 = vpow2.f32 %v2495_v51 }
0x14f9   :  { %v2201_v52 = vpop.f32.mrb[14].mxu1 }
0x14fa   :  { %v2205_v53 = vadd.f32 %v2201_v52, %v2134_v8  ;;  %v2893_v54 = vpop.f32.mrb[15].mxu1 }
0x14fc   :  { %v2499_v55 = vmul.f32 -1.442695, %v2205_v53 }
0x14fe   :  { %3183 = vpow2.f32 %v2499_v55 }
0x1500   :  { %v3182_v11 = vpop.eup %3181 }
0x1501   :  { %v2035_v56 = vadd.f32 1.0, %v3182_v11 }
0x1503   :  { %3185 = vrcp.f32 %v2035_v56 }
0x1508   :  { %v3184_v57 = vpop.eup %3183 }
0x1509   :  { %v2209_v58 = vadd.f32 1.0, %v3184_v57 }
0x150b   :  { %3187 = vrcp.f32 %v2209_v58 }
0x150d   :  { %v3186_v59 = vpop.eup %3185 }
0x150e   :  { %v2038_v60 = vmul.f32 2.0, %v3186_v59  ;;  %v2040_v7 = vmul.f32 %v3186_v59, %v3597_v31 }
0x1510   :  { %v2496_v61 = vadd.f32 -1.0, %v2038_v60 }
0x1512   :  { %2042 = vrot.lane.b32.xlu0 %v2496_v61, %s3282_s1 }
0x1515   :  { %v3188_v62 = vpop.eup %3187 }
0x1516   :  { %v2212_v63 = vmul.f32 2.0, %v3188_v62  ;;  %v2214_v12 = vmul.f32 %v3188_v62, %v3601_v35  ;;  %v2339_v35 = vld [vmem:[#allocation7 + $0x90] sm:$0xff] }
0x1517   :  { %v3067_v40 = vpack.c.bf16 %v2340_v38, %v2339_v35 }
0x1518   :  { %v2500_v2 = vadd.f32 -1.0, %v2212_v63 }
0x1519   :  { %3068 = vmatpush3.bf16.msra.mxu1 %v3067_v40 }
0x151a   :  { %2216 = vrot.lane.b32.xlu1 %v2500_v2, %s3282_s1 }
0x1584   :  { %v2043_v3 = vpop.permute.xlu0 %2042 }
0x1585   :  { %v2045_v4 = vmul.f32 %v3186_v59, %v2043_v3 }
0x1587   :  { %2047 = vrot.lane.b32.xlu0 %v2045_v4, %s3283_s6 }
0x158c   :  { %v2217_v5 = vpop.permute.xlu1 %2216 }
0x158d   :  { %v2219_v6 = vmul.f32 %v3188_v62, %v2217_v5 }
0x158f   :  { %2221 = vrot.lane.b32.xlu1 %v2219_v6, %s3283_s6 }
0x15f9   :  { %v2048_v9 = vpop.permute.xlu0 %2047 }
0x15fa   :  { %v2050_v10 = vadd.f32 %v2048_v9, %v2040_v7 }
0x15fc   :  { %3189 = vtanh.f32 %v2050_v10 }
0x1601   :  { %v2222_v13 = vpop.permute.xlu1 %2221 }
0x1602   :  { %v2224_v14 = vadd.f32 %v2222_v13, %v2214_v12 }
0x1604   :  { %3191 = vtanh.f32 %v2224_v14 }
0x1606   :  { %v3190_v15 = vpop.eup %3189 }
0x1607   :  { %2053 = vrot.lane.b32.xlu0 %v3190_v15, %s3282_s1 }
0x160e   :  { %v3192_v34 = vpop.eup %3191 }
0x160f   :  { %2227 = vrot.lane.b32.xlu1 %v3192_v34, %s3282_s1 }
0x1679   :  { %v2054_v16 = vpop.permute.xlu0 %2053 }
0x167a   :  { %v2056_v17 = vmul.f32 %v3186_v59, %v2054_v16 }
0x167c   :  { %2058 = vrot.lane.b32.xlu0 %v2056_v17, %s3283_s6 }
0x1681   :  { %v2228_v18 = vpop.permute.xlu1 %2227 }
0x1682   :  { %v2230_v19 = vmul.f32 %v3188_v62, %v2228_v18 }
0x1684   :  { %2232 = vrot.lane.b32.xlu1 %v2230_v19, %s3283_s6 }
0x16ee   :  { %v2059_v36 = vpop.permute.xlu0 %2058 }
0x16ef   :  { %2061 = vst.msk [vmem:[#allocation3 + $0x6] sm:$0x1] %vm410_vm3, %v2059_v36  ;;  %2881 = vmatmul.mubr.msk.f32.vlgmr.msra.gmra.mrb[16].mxu0 %vm134_vm2, %v2059_v36 }
0x16f0   :  { %3059 = vmatpush3.bf16.msra.mxu0 %v3365_v39  ;;  %2902 = vmatprep.mubr.msk.f32.mxu0 %vm3280_vm0, %v3281_v1 }
0x16f1   :  { %3060 = vmatprep.subr.bf16.mxu0 %v3279_v0 }
0x16f4   :  { %3062 = vmatpush3.bf16.msra.mxu0 %v3373_v43 }
0x16f6   :  { %v2233_v20 = vpop.permute.xlu1 %2232 }
0x16f7   :  { %2903 = vmatmul.mubr.msk.f32.vlgmr.msra.gmra.mrb[16].mxu0 %vm134_vm2, %v2233_v20 }
0x17ca   :  { %v2302_v21 = vpop.f32.mrb[16].mxu0 }
0x17cb   :  { %v3076_v22 = vadd.f32 %v2302_v21, %v3395_v47  ;;  %v2904_v23 = vpop.f32.mrb[17].mxu0 }
0x17cd   :  { %v2502_v24 = vmul.f32 -1.442695, %v3076_v22 }
0x17cf   :  { %3193 = vpow2.f32 %v2502_v24 }
0x17d9   :  { %v3194_v25 = vpop.eup %3193 }
0x17da   :  { %v2310_v26 = vadd.f32 1.0, %v3194_v25 }
0x17dc   :  { %3195 = vrcp.f32 %v2310_v26 }
0x17e6   :  { %v3196_v39 = vpop.eup %3195 }
0x17e7   :  { %v2313_v27 = vmul.f32 2.0, %v3196_v39  ;;  %v2315_v43 = vmul.f32 %v3196_v39, %v2050_v10 }
0x17e9   :  { %v2503_v28 = vadd.f32 -1.0, %v2313_v27 }
0x17eb   :  { %2317 = vrot.lane.b32.xlu0 %v2503_v28, %s3282_s1 }
0x185d   :  { %v2318_v1 = vpop.permute.xlu0 %2317 }
0x185e   :  { %v2320_v29 = vmul.f32 %v3196_v39, %v2318_v1 }
0x1860   :  { %2322 = vrot.lane.b32.xlu1 %v2320_v29, %s3283_s6 }
0x18d2   :  { %v2323_v30 = vpop.permute.xlu1 %2322 }
0x18d3   :  { %v2325_v31 = vadd.f32 %v2323_v30, %v2315_v43 }
0x18d5   :  { %3197 = vtanh.f32 %v2325_v31 }
0x18df   :  { %v3198_v47 = vpop.eup %3197 }
0x18e0   :  { %2328 = vrot.lane.b32.xlu0 %v3198_v47, %s3282_s1 }
0x1952   :  { %v2329_v41 = vpop.permute.xlu0 %2328 }
0x1953   :  { %v2331_v42 = vmul.f32 %v3196_v39, %v2329_v41 }
0x1955   :  { %2333 = vrot.lane.b32.xlu1 %v2331_v42, %s3283_s6 }
0x19c7   :  { %v2334_v44 = vpop.permute.xlu1 %2333 }
0x19c8   :  { %2336 = vst.msk [vmem:[#allocation3 + $0x7] sm:$0x1] %vm410_vm3, %v2334_v44 }
0x19cf   :  { %v2342_v45 = vld [vmem:[#allocation3] sm:$0xff] }
0x19d0   :  { %2914 = vmatmul.mubr.msk.f32.vlgmr.msra.gmra.mrb[16].mxu1 %vm134_vm2, %v2342_v45 }
0x1aa3   :  { %v2416_v48 = vpop.f32.mrb[16].mxu1 }
0x1aa4   :  { %v2417_v49 = vadd.f32 %v2504_v46, %v2416_v48  ;;  %v2915_v50 = vpop.f32.mrb[17].mxu1 }
0x1aa6   :  { %2420 = vmax.xlane.f32.xlu0 %v2417_v49 }
0x1b33   :  { %v2421_v51 = vpop.xlane.xlu0 %2420 }
0x1b34   :  { %v2422_v8 = vsub.f32 %v2417_v49, %v2421_v51 }
0x1b36   :  { %v2423_v52 = vmul.f32 1.442695, %v2422_v8 }
0x1b38   :  { %3199 = vpow2.f32 %v2423_v52 }
0x1b42   :  { %v3200_v0 = vpop.eup %3199 }
0x1b43   :  { %2425 = vadd.xlane.f32.xlu1 %v3200_v0 }
0x1bd0   :  { %v2426_v53 = vpop.xlane.xlu1 %2425 }
0x1bd1   :  { %3201 = vlog2.f32 %v2426_v53 }
0x1bdb   :  { %v3202_v54 = vpop.eup %3201 }
0x1bdc   :  { %v2428_v55 = vmul.f32 0.6931472, %v3202_v54 }
0x1bde   :  { %v2429_v11 = vadd.f32 %v2428_v55, %v2421_v51 }
0x1be0   :  { %v2430_v56 = vsub.f32 %v2417_v49, %v2429_v11 }
0x1be2   :  { %2431 = vst [vmem:[#allocation9] sm:$0xff] %v2430_v56 }
0x1be3   :  { %3258 = shalt.err (!%p3255_p6)
}
0x1be4   :  { %s3259_s12 = scalar_lea.hbm %s3667_s2, 128 }
0x1be5   :  { %p3260_p7 = scmp.ne.s32.totalorder %s3667_s2, %s3259_s12  ;;  %p3263_p8 = scmp.lt.u32.totalorder %s3259_s12, %s3667_s2 }
0x1be7   :  { %p3265_p9 = pnand %p3263_p8, %p3260_p7 }
0x1be9   :  { %3268 = shalt.err (!%p3265_p9)
}
0x1bea   :  { %2441 = dma.vmem_to_hbm [thread:$0]  %s2439_s8, 128, %s3667_s2, [#allocation6]  }
0x1beb   :  { %3273 = dma.done.wait [#allocation6], 128  }
0x1bec   :  { %3274 = vsyncadd [#allocation6], 4294967168 }
0x1bed   :  { %2445 = vsyncpa [#allocation5], 1 }
0x1bee   :  { %2446 = vsyncpa [#allocation8], 1 }
0x1bef   :  { %2447 = vsyncpa [#allocation6], 1 }

</bundles_post_ra>
